<compile_context>
chip_gen: v7x
topology: tpu7x:2x2x1
jax: 0.10.0
libtpu: 0.0.40
codegen_flags: <defaults>
</compile_context>

<pallas_src>
import functools

import jax
import jax.numpy as jnp
from jax import lax
from jax.experimental import pallas as pl
from jax.experimental.pallas import tpu as pltpu


def _barlow_twins_kernel(*refs, block_feat, row_slab, inv_batch, lambda_,
                         batch_norm):
    if batch_norm:
        h1_ref, h2_ref, col_ref, row_ref, out_ref, gram_ref = refs
    else:
        h1_ref, h2_ref, out_ref, gram_ref = refs
        col_ref = row_ref = None

    # Grid queries at top level only (values are closed over by the pl.when
    # bodies); binding program_id inside a cond body breaks fallback lowering.
    j = pl.program_id(0)
    k = pl.program_id(1)
    nk = pl.num_programs(1)

    # ---- init the Gram accumulator on the first batch step ------------------
    @pl.when(k == 0)
    def _init():
        gram_ref[...] = jnp.zeros_like(gram_ref)

    # ---- raw Gram on the MXU: bf16 operands, f32 accumulation ---------------
    # dot_general contracts axis 0 of both operands (h1_block^T @ h2_block); the
    # MXU consumes the transposed LHS directly (no XLU transpose).
    gram_ref[...] += lax.dot_general(
        h1_ref[...], h2_ref[...],
        dimension_numbers=(((0,), (0,)), ((), ())),
        preferred_element_type=jnp.float32)

    # ---- epilogue: folded normalization + loss reduction, last batch step ---
    @pl.when(k == nk - 1)
    def _finish():
        feat_dim = gram_ref.shape[0]
        n_slabs = feat_dim // row_slab

        if batch_norm:
            m2_row = row_ref[0:1, :]      # (1, TJ)  mean(h2) of this col tile
            b_row = row_ref[1:2, :]       # (1, TJ)  1 / (std(h2) + eps)

        def norm_slab(r0, rows):
            """Normalized correlation sub-block c[r0:r0+rows, tile_cols]."""
            g = gram_ref[pl.ds(r0, rows), :]
            if not batch_norm:
                return g * inv_batch
            bm1 = col_ref[pl.ds(r0, rows), 0:1]     # (rows, 1)  B * mean(h1)
            a_col = col_ref[pl.ds(r0, rows), 1:2]   # (rows, 1)  1/((std1+eps)*B)
            return (g - bm1 * m2_row) * a_col * b_row

        # sum(c^2) over the whole (D, TJ) tile, chunked over row slabs so the
        # epilogue never holds more than a few (row_slab, TJ) f32 temporaries.
        if n_slabs == 1:
            c_full = norm_slab(0, feat_dim)
            sum_sq = jnp.sum(c_full * c_full, keepdims=True)         # (1, 1)
        else:
            def body(r, acc):
                cs = norm_slab(r * row_slab, row_slab)
                return acc + jnp.sum(cs * cs, keepdims=True)
            sum_sq = lax.fori_loop(0, n_slabs, body,
                                   jnp.zeros((1, 1), jnp.float32),
                                   unroll=True)

        # Diagonal entries of this column tile live in rows [j*TJ, (j+1)*TJ):
        # only this (TJ, TJ) sub-block is re-normalized and masked.
        csub = norm_slab(j * block_feat, block_feat)                  # (TJ, TJ)
        rid = lax.broadcasted_iota(jnp.int32, (block_feat, block_feat), 0)
        cid = lax.broadcasted_iota(jnp.int32, (block_feat, block_feat), 1)
        diag = jnp.sum(jnp.where(rid == cid, csub, 0.0), axis=0,
                       keepdims=True)                                 # (1, TJ)

        on_diag = jnp.sum((1.0 - diag) ** 2, keepdims=True)           # (1, 1)
        diag_sq = jnp.sum(diag * diag, keepdims=True)                 # (1, 1)
        partial = on_diag + lambda_ * (sum_sq - diag_sq)              # (1, 1)

        # Lane-dense (8, 128) store of this feature tile's partial loss.
        out_ref[...] = jnp.broadcast_to(partial, (8, 128))


def _pick_block(n, candidates):
    for c in candidates:
        if c <= n and n % c == 0:
            return c
    return n


def _vmem_capacity_bytes():
    try:
        info = pltpu.get_tpu_info()
        cap = int(getattr(info, "vmem_capacity_bytes", 0))
        if cap > 0:
            return cap
    except Exception:
        pass
    return 128 * 1024 * 1024


def _vmem_estimate(feat_dim, block_batch, block_feat, row_slab, batch_norm):
    est = 2 * block_batch * feat_dim * 2         # h1 blocks, bf16, double-buffered
    est += 2 * block_batch * block_feat * 2      # h2 blocks, bf16, double-buffered
    est += 2 * 8 * 128 * 4                       # output blocks
    est += feat_dim * block_feat * 4             # Gram accumulator scratch
    if batch_norm:
        est += 2 * feat_dim * 128 * 4            # (D, 2) col stats, lane-padded
        est += 2 * 8 * block_feat * 4            # (2, TJ) row stats, sublane-padded
    est += 3 * max(row_slab, block_feat) * block_feat * 4   # epilogue temporaries
    return est


def barlow_twins_contrastive_loss(h1, h2, lambda_=None, batch_norm=True,
                                  eps=1e-5, *, block_batch=None,
                                  block_feat=None):
    assert h1.shape == h2.shape and h1.ndim == 2
    batch_size, feat_dim = h1.shape
    if batch_norm:
        assert batch_size > 1, "unbiased std needs batch_size > 1"
    lam = (1.0 / feat_dim) if lambda_ is None else float(lambda_)

    # ---- generation-aware tile selection ------------------------------------
    cap = _vmem_capacity_bytes()
    budget = int(cap * 0.6)                      # leave room for double-buffering slack
    if block_feat is None:
        # v6e/v7x MXU tiles are 256x256: prefer 512/256, skip 384/128 when possible.
        block_feat = _pick_block(feat_dim, [512, 256, 128])
    if block_batch is None:
        block_batch = _pick_block(batch_size, [512, 256, 128, 64, 32, 16, 8])
    row_slab = _pick_block(feat_dim, [512, 256, 128, 64, 32, 16, 8])

    # Shrink tiles until the estimate fits comfortably on this chip's VMEM.
    while (_vmem_estimate(feat_dim, block_batch, block_feat, row_slab,
                          batch_norm) > budget
           and block_feat > 128 and feat_dim % (block_feat // 2) == 0):
        block_feat //= 2
    while (_vmem_estimate(feat_dim, block_batch, block_feat, row_slab,
                          batch_norm) > budget
           and block_batch > 8 and batch_size % (block_batch // 2) == 0):
        block_batch //= 2

    assert feat_dim % block_feat == 0, "block_feat must divide feature_dim"
    assert batch_size % block_batch == 0, "block_batch must divide batch_size"
    assert block_feat == feat_dim or block_feat % 128 == 0
    assert block_batch == batch_size or block_batch % 8 == 0
    assert feat_dim % row_slab == 0

    nj = feat_dim // block_feat
    nk = batch_size // block_batch

    # ---- wrapper-side precompute --------------------------------------------
    # bf16 Gram operands (halves the nj-fold HBM re-streaming of h1); f32
    # per-feature moments and normalization scales computed once here, so the
    # kernel's hot loop is a single bf16 MXU matmul per step.
    h1_bf = h1.astype(jnp.bfloat16)
    h2_bf = h2.astype(jnp.bfloat16)
    operands = [h1_bf, h2_bf]
    in_specs = [
        pl.BlockSpec((block_batch, feat_dim), lambda jx, kx: (kx, 0)),
        pl.BlockSpec((block_batch, block_feat), lambda jx, kx: (kx, jx)),
    ]
    if batch_norm:
        h1f = h1.astype(jnp.float32)
        h2f = h2.astype(jnp.float32)
        m1 = jnp.mean(h1f, axis=0)
        m2 = jnp.mean(h2f, axis=0)
        std1 = jnp.std(h1f, axis=0, ddof=1)        # torch.std default: unbiased
        std2 = jnp.std(h2f, axis=0, ddof=1)
        a_col = 1.0 / ((std1 + eps) * batch_size)  # 1/B folded into column scale
        b_row = 1.0 / (std2 + eps)
        # (D, 2): lane 0 = B*mean(h1), lane 1 = a_col;  (2, D): rows m2, b_row.
        col_stats = jnp.stack([batch_size * m1, a_col], axis=1).astype(jnp.float32)
        row_stats = jnp.stack([m2, b_row], axis=0).astype(jnp.float32)
        operands += [col_stats, row_stats]
        in_specs += [
            pl.BlockSpec((feat_dim, 2), lambda jx, kx: (0, 0)),
            pl.BlockSpec((2, block_feat), lambda jx, kx: (0, jx)),
        ]

    kernel = functools.partial(
        _barlow_twins_kernel,
        block_feat=block_feat, row_slab=row_slab,
        inv_batch=float(1.0 / batch_size), lambda_=lam, batch_norm=batch_norm)

    est = _vmem_estimate(feat_dim, block_batch, block_feat, row_slab, batch_norm)
    headroom = 8 * 1024 * 1024
    vmem_limit = int(min(max(est * 3 // 2, 32 * 1024 * 1024), cap - headroom))

    grid_spec = pltpu.PrefetchScalarGridSpec(
        num_scalar_prefetch=0,
        grid=(nj, nk),                           # batch (reduction) axis innermost
        in_specs=in_specs,
        out_specs=pl.BlockSpec((8, 128), lambda jx, kx: (jx, 0)),
        scratch_shapes=[pltpu.VMEM((feat_dim, block_feat), jnp.float32)],
    )

    out = pl.pallas_call(
        kernel,
        out_shape=jax.ShapeDtypeStruct((nj * 8, 128), jnp.float32),
        grid_spec=grid_spec,
        compiler_params=pltpu.CompilerParams(
            dimension_semantics=("parallel", "arbitrary"),
            vmem_limit_bytes=vmem_limit),
    )(*operands)

    partials = out.reshape(nj, 8, 128)[:, 0, 0]
    return jnp.sum(partials)


def _reference_loss(h1, h2, lambda_=None, batch_norm=True, eps=1e-5):
    # Pure-JAX mirror of the PyTorch forward (unbiased std, eps added to std).
    b, d = h1.shape
    lam = (1.0 / d) if lambda_ is None else lambda_
    if batch_norm:
        z1 = (h1 - h1.mean(axis=0)) / (h1.std(axis=0, ddof=1) + eps)
        z2 = (h2 - h2.mean(axis=0)) / (h2.std(axis=0, ddof=1) + eps)
        c = (z1.T @ z2) / b
    else:
        c = (h1.T @ h2) / b
    eye = jnp.eye(d, dtype=bool)
    loss = jnp.sum((1.0 - jnp.diagonal(c)) ** 2)
    loss += lam * jnp.sum(jnp.where(eye, 0.0, c) ** 2)
    return loss


if __name__ == "__main__":
    key = jax.random.PRNGKey(0)
    k1, k2 = jax.random.split(key)
    B, D = 32, 256
    base1 = jax.random.normal(k1, (B, D), dtype=jnp.float32)
    base2 = jax.random.normal(k2, (B, D), dtype=jnp.float32)
    offsets = jnp.linspace(-0.5, 0.5, D, dtype=jnp.float32)
    h1 = base1 + offsets
    h2 = 0.6 * h1 + 0.8 * base2 + 0.25

    # Batch-normalized path; explicit small tiles force a (2 x 2) grid so both
    # the feature tiling and the batch-reduction accumulation are exercised.
    loss_bn = barlow_twins_contrastive_loss(
        h1, h2, batch_norm=True, block_batch=16, block_feat=128)
    jax.block_until_ready(loss_bn)
    ref_bn = _reference_loss(h1, h2, batch_norm=True)
    assert jnp.allclose(loss_bn, ref_bn, rtol=5e-2, atol=5e-2), (loss_bn, ref_bn)

    # Raw-correlation path (batch_norm=False), auto-picked tiles.
    loss_raw = barlow_twins_contrastive_loss(h1, h2, lambda_=5e-3,
                                             batch_norm=False)
    jax.block_until_ready(loss_raw)
    ref_raw = _reference_loss(h1, h2, lambda_=5e-3, batch_norm=False)
    assert jnp.allclose(loss_raw, ref_raw, rtol=5e-2, atol=5e-2), (loss_raw, ref_raw)

    print("KERNEL_OK")
</pallas_src>

<mosaic_0001>
module attributes {stable_mosaic.version = 11 : i64} {
  func.func @_barlow_twins_kernel(%arg0: i32, %arg1: i32, %arg2: memref<16x256xbf16, #tpu.memory_space<vmem>>, %arg3: memref<16x128xbf16, #tpu.memory_space<vmem>>, %arg4: memref<256x2xf32, #tpu.memory_space<vmem>>, %arg5: memref<2x128xf32, #tpu.memory_space<vmem>>, %arg6: memref<8x128xf32, #tpu.memory_space<vmem>>, %arg7: memref<256x128xf32, #tpu.memory_space<vmem>>) attributes {dimension_semantics = [#tpu.dimension_semantics<parallel>, #tpu.dimension_semantics<arbitrary>], iteration_bounds = array<i64: 2, 2>, scalar_prefetch = 0 : i64, scratch_operands = 1 : i64, tpu.core_type = #tpu.core_type<tc>, window_params = [{transform_indices = @transform_0, window_bounds = array<i64: 16, 256>}, {transform_indices = @transform_1, window_bounds = array<i64: 16, 128>}, {pipeline_mode = #tpu.pipeline_mode<synchronous>, transform_indices = @transform_2, window_bounds = array<i64: 256, 2>}, {transform_indices = @transform_3, window_bounds = array<i64: 2, 128>}, {transform_indices = @transform_4, window_bounds = array<i64: 8, 128>}]} {
    %c0_i32 = arith.constant 0 : i32
    %0 = arith.cmpi eq, %arg1, %c0_i32 : i32
    %1 = arith.extui %0 : i1 to i32
    %c0_i32_0 = arith.constant 0 : i32
    %2 = arith.cmpi ne, %1, %c0_i32_0 : i32
    scf.if %2 {
      %cst_9 = arith.constant 0.000000e+00 : f32
      %12 = vector.broadcast %cst_9 : f32 to vector<256x128xf32>
      %c0_10 = arith.constant 0 : index
      %c0_11 = arith.constant 0 : index
      %13 = vector.load %arg7[%c0_10, %c0_11] : memref<256x128xf32, #tpu.memory_space<vmem>>, vector<256x128xf32>
      tpu.vector_store %arg7[%c0_10, %c0_11], %12 {strides = array<i32>} : memref<256x128xf32, #tpu.memory_space<vmem>>, vector<256x128xf32>,
    } else {
    }
    %c0 = arith.constant 0 : index
    %c0_1 = arith.constant 0 : index
    %3 = vector.load %arg7[%c0, %c0_1] : memref<256x128xf32, #tpu.memory_space<vmem>>, vector<256x128xf32>
    %c0_2 = arith.constant 0 : index
    %c0_3 = arith.constant 0 : index
    %4 = vector.load %arg2[%c0_2, %c0_3] : memref<16x256xbf16, #tpu.memory_space<vmem>>, vector<16x256xbf16>
    %c0_4 = arith.constant 0 : index
    %c0_5 = arith.constant 0 : index
    %5 = vector.load %arg3[%c0_4, %c0_5] : memref<16x128xbf16, #tpu.memory_space<vmem>>, vector<16x128xbf16>
    %cst = arith.constant dense<0.000000e+00> : vector<256x128xf32>
    %6 = tpu.matmul %4, %5, %cst {dimension_numbers = #tpu.dot_dimension_numbers<[0], [0], [1], [1], [0, 1, 1, 1], [], []>} : vector<16x256xbf16>, vector<16x128xbf16>, vector<256x128xf32> -> vector<256x128xf32>
    %7 = arith.addf %3, %6 : vector<256x128xf32>
    %c0_6 = arith.constant 0 : index
    %c0_7 = arith.constant 0 : index
    %8 = vector.load %arg7[%c0_6, %c0_7] : memref<256x128xf32, #tpu.memory_space<vmem>>, vector<256x128xf32>
    tpu.vector_store %arg7[%c0_6, %c0_7], %7 {strides = array<i32>} : memref<256x128xf32, #tpu.memory_space<vmem>>, vector<256x128xf32>,
    %c1_i32 = arith.constant 1 : i32
    %9 = arith.cmpi eq, %arg1, %c1_i32 : i32
    %10 = arith.extui %9 : i1 to i32
    %c0_i32_8 = arith.constant 0 : i32
    %11 = arith.cmpi ne, %10, %c0_i32_8 : i32
    scf.if %11 {
      %c0_9 = arith.constant 0 : index
      %c0_10 = arith.constant 0 : index
      %12 = vector.load %arg5[%c0_9, %c0_10] : memref<2x128xf32, #tpu.memory_space<vmem>>, vector<1x128xf32>
      %c1 = arith.constant 1 : index
      %c0_11 = arith.constant 0 : index
      %13 = vector.load %arg5[%c1, %c0_11] : memref<2x128xf32, #tpu.memory_space<vmem>>, vector<1x128xf32>
      %c0_12 = arith.constant 0 : index
      %c0_13 = arith.constant 0 : index
      %14 = vector.load %arg7[%c0_12, %c0_13] : memref<256x128xf32, #tpu.memory_space<vmem>>, vector<256x128xf32>
      %c0_14 = arith.constant 0 : index
      %c0_15 = arith.constant 0 : index
      %15 = vector.load %arg4[%c0_14, %c0_15] : memref<256x2xf32, #tpu.memory_space<vmem>>, vector<256x1xf32>
      %c0_16 = arith.constant 0 : index
      %c1_17 = arith.constant 1 : index
      %16 = vector.load %arg4[%c0_16, %c1_17] : memref<256x2xf32, #tpu.memory_space<vmem>>, vector<256x1xf32>
      %17 = vector.broadcast %15 : vector<256x1xf32> to vector<256x128xf32>
      %18 = vector.broadcast %12 : vector<1x128xf32> to vector<256x128xf32>
      %19 = arith.mulf %17, %18 : vector<256x128xf32>
      %20 = arith.subf %14, %19 : vector<256x128xf32>
      %21 = vector.broadcast %16 : vector<256x1xf32> to vector<256x128xf32>
      %22 = arith.mulf %20, %21 : vector<256x128xf32>
      %23 = vector.broadcast %13 : vector<1x128xf32> to vector<256x128xf32>
      %24 = arith.mulf %22, %23 : vector<256x128xf32>
      %25 = arith.mulf %24, %24 : vector<256x128xf32>
      %26 = vector.shape_cast %25 : vector<256x128xf32> to vector<1x256x128xf32>
      %cst_18 = arith.constant dense<0.000000e+00> : vector<1xf32>
      %27 = vector.multi_reduction <add>, %26, %cst_18 [1, 2] : vector<1x256x128xf32> to vector<1xf32>
      %28 = vector.shape_cast %27 : vector<1xf32> to vector<1x1x1xf32>
      %29 = vector.extract %28[0, 0, 0] : f32 from vector<1x1x1xf32>
      %30 = vector.broadcast %29 : f32 to vector<1x1xf32>
      %c128_i32 = arith.constant 128 : i32
      %31 = arith.muli %arg0, %c128_i32 : i32
      %32 = arith.index_cast %31 : i32 to index
      %c0_19 = arith.constant 0 : index
      %33 = vector.load %arg7[%32, %c0_19] : memref<256x128xf32, #tpu.memory_space<vmem>>, vector<128x128xf32>
      %34 = arith.index_cast %31 : i32 to index
      %c0_20 = arith.constant 0 : index
      %35 = vector.load %arg4[%34, %c0_20] : memref<256x2xf32, #tpu.memory_space<vmem>>, vector<128x1xf32>
      %36 = arith.index_cast %31 : i32 to index
      %c1_21 = arith.constant 1 : index
      %37 = vector.load %arg4[%36, %c1_21] : memref<256x2xf32, #tpu.memory_space<vmem>>, vector<128x1xf32>
      %38 = vector.broadcast %35 : vector<128x1xf32> to vector<128x128xf32>
      %39 = vector.broadcast %12 : vector<1x128xf32> to vector<128x128xf32>
      %40 = arith.mulf %38, %39 : vector<128x128xf32>
      %41 = arith.subf %33, %40 : vector<128x128xf32>
      %42 = vector.broadcast %37 : vector<128x1xf32> to vector<128x128xf32>
      %43 = arith.mulf %41, %42 : vector<128x128xf32>
      %44 = vector.broadcast %13 : vector<1x128xf32> to vector<128x128xf32>
      %45 = arith.mulf %43, %44 : vector<128x128xf32>
      %46 = tpu.iota {dimensions = array<i32: 0>} : vector<128x128xi32>
      %47 = tpu.iota {dimensions = array<i32: 1>} : vector<128x128xi32>
      %48 = arith.cmpi eq, %46, %47 : vector<128x128xi32>
      %cst_22 = arith.constant 0.000000e+00 : f32
      %49 = vector.broadcast %cst_22 : f32 to vector<128x128xf32>
      %50 = arith.select %48, %45, %49 : vector<128x128xi1>, vector<128x128xf32>
      %cst_23 = arith.constant dense<0.000000e+00> : vector<128xf32>
      %51 = vector.multi_reduction <add>, %50, %cst_23 [0] : vector<128x128xf32> to vector<128xf32>
      %52 = vector.shape_cast %51 : vector<128xf32> to vector<1x128xf32>
      %cst_24 = arith.constant 1.000000e+00 : f32
      %53 = vector.broadcast %cst_24 : f32 to vector<1x128xf32>
      %54 = arith.subf %53, %52 : vector<1x128xf32>
      %55 = arith.mulf %54, %54 : vector<1x128xf32>
      %56 = vector.shape_cast %55 : vector<1x128xf32> to vector<1x1x128xf32>
      %cst_25 = arith.constant dense<0.000000e+00> : vector<1xf32>
      %57 = vector.multi_reduction <add>, %56, %cst_25 [1, 2] : vector<1x1x128xf32> to vector<1xf32>
      %58 = vector.shape_cast %57 : vector<1xf32> to vector<1x1x1xf32>
      %59 = vector.extract %58[0, 0, 0] : f32 from vector<1x1x1xf32>
      %60 = vector.broadcast %59 : f32 to vector<1x1xf32>
      %61 = arith.mulf %52, %52 : vector<1x128xf32>
      %62 = vector.shape_cast %61 : vector<1x128xf32> to vector<1x1x128xf32>
      %cst_26 = arith.constant dense<0.000000e+00> : vector<1xf32>
      %63 = vector.multi_reduction <add>, %62, %cst_26 [1, 2] : vector<1x1x128xf32> to vector<1xf32>
      %64 = vector.shape_cast %63 : vector<1xf32> to vector<1x1x1xf32>
      %65 = vector.extract %64[0, 0, 0] : f32 from vector<1x1x1xf32>
      %66 = vector.broadcast %65 : f32 to vector<1x1xf32>
      %67 = arith.subf %30, %66 : vector<1x1xf32>
      %cst_27 = arith.constant 3.906250e-03 : f32
      %68 = vector.broadcast %cst_27 : f32 to vector<1x1xf32>
      %69 = arith.mulf %68, %67 : vector<1x1xf32>
      %70 = arith.addf %60, %69 : vector<1x1xf32>
      %71 = vector.shape_cast %70 : vector<1x1xf32> to vector<1x1xf32>
      %72 = vector.broadcast %71 : vector<1x1xf32> to vector<8x128xf32>
      %c0_28 = arith.constant 0 : index
      %c0_29 = arith.constant 0 : index
      %73 = vector.load %arg6[%c0_28, %c0_29] : memref<8x128xf32, #tpu.memory_space<vmem>>, vector<8x128xf32>
      tpu.vector_store %arg6[%c0_28, %c0_29], %72 {strides = array<i32>} : memref<8x128xf32, #tpu.memory_space<vmem>>, vector<8x128xf32>,
    } else {
    }
    return
  }
  func.func @transform_0(%arg0: i32, %arg1: i32) -> (i32, i32) {
    %c0_i32 = arith.constant 0 : i32
    %c0_i32_0 = arith.constant 0 : i32
    return %arg1, %c0_i32 : i32, i32
  }
  func.func @transform_1(%arg0: i32, %arg1: i32) -> (i32, i32) {
    %c0_i32 = arith.constant 0 : i32
    return %arg1, %arg0 : i32, i32
  }
  func.func @transform_2(%arg0: i32, %arg1: i32) -> (i32, i32) {
    %c0_i32 = arith.constant 0 : i32
    %c0_i32_0 = arith.constant 0 : i32
    %c0_i32_1 = arith.constant 0 : i32
    return %c0_i32, %c0_i32_0 : i32, i32
  }
  func.func @transform_3(%arg0: i32, %arg1: i32) -> (i32, i32) {
    %c0_i32 = arith.constant 0 : i32
    %c0_i32_0 = arith.constant 0 : i32
    return %c0_i32, %arg0 : i32, i32
  }
  func.func @transform_4(%arg0: i32, %arg1: i32) -> (i32, i32) {
    %c0_i32 = arith.constant 0 : i32
    %c0_i32_0 = arith.constant 0 : i32
    return %arg0, %c0_i32 : i32, i32
  }
}

</mosaic_0001>

<bundles_post_ra>
// kernel: tpu_custom_call.1
= control target key start
LH: loop header
LB: loop body
LE: loop exit
PB: predicated region body
PF: predicated region fallthrough
CT: control target
= control target key end

     0   :  { %s2866_s0 = inlined_call_operand.vmem [shape: bf16[32,256], index: 0, kind: input, shape index: {}]   ;;  %s2867_s1 = inlined_call_operand.vmem [shape: bf16[32,256], index: 1, kind: input, shape index: {}]   ;;  %s2868_s2 = inlined_call_operand.vmem [shape: f32[256,2], index: 2, kind: input, shape index: {}]   ;;  %s2869_s3 = inlined_call_operand.vmem [shape: f32[2,256], index: 3, kind: input, shape index: {}]   ;;  %s2870_s4 = inlined_call_operand.hbm [shape: f32[16,128], index: 4, kind: output, shape index: {}]  }
   0x1   :  { %2874 = sst [smem:[#allocation9_spill]] %s2867_s1 }
   0x2   :  { %9 = vsyncpa [#allocation5], 0 }
   0x3   :  { %11 = vsyncpa [#allocation5 + $0x1], 0  ;;  %s2084_s15 = smov 0   ;;  %s2086_s16 = smov 0  }
   0x4   :  { %s2088_s17 = smov 0   ;;  %s2090_s18 = smov 0  }
   0x5   :  { %s2092_s19 = smov 0   ;;  %s2094_s20 = smov 0  }
   0x6   :  { %s2096_s21 = smov 0   ;;  %s2098_s22 = smov 0  }
   0x7   :  { %s2100_s23 = smov 0   ;;  %s2102_s24 = smov 0  }
   0x8 LB: > { %s1728_s25 = sadd.s32 4294967295, %s2053_s24   ;;  %s1729_s26 = sadd.s32 4294967294, %s2053_s24   ;;  %s2053_s24 = sphi %s2102_s24, %s17_s24   ;;  %s2049_s23 = sphi %s2100_s23, %s2892_s23   ;;  %s2045_s22 = sphi %s2098_s22, %s2891_s22   ;;  %s2041_s21 = sphi %s2096_s21, %s2890_s21   ;;  %s2037_s20 = sphi %s2094_s20, %s2889_s20   ;;  %s2033_s19 = sphi %s2092_s19, %s2888_s19   ;;  %s2029_s18 = sphi %s2090_s18, %s2887_s18   ;;  %s2025_s17 = sphi %s2088_s17, %s2886_s17   ;;  %s2021_s16 = sphi %s2086_s16, %s2885_s16   ;;  %s2017_s15 = sphi %s2084_s15, %s2884_s15  }
   0x9   : > { %s26_s27 = sadd.s32 1, %s2045_s22  ;;  %s29_s28 = sadd.s32 1, %s2049_s23 }
   0xa   : > { %p27_p0 = scmp.ge.s32.totalorder %s26_s27, 2  ;;  %s64_s29 = sadd.s32 1, %s2033_s19 }
   0xb   : > { %p71_p1 = scmp.ne.s32.totalorder %s2033_s19, %s2029_s18  ;;  %p72_p2 = scmp.eq.s32.totalorder %s2053_s24, 0 }
   0xc   : > { %s2894_s27 = smov (%p27_p0, %s26_s27), 0  ;;  %s2896_s28 = smov (!%p27_p0, %s29_s28), %s2049_s23 }
   0xd   : > { %2875 = sst [smem:[#allocation7_spill]] %s2894_s27  ;;  %s59_s30 = ssub.s32 %s2045_s22, %s2894_s27 }
   0xe   : > { %p2147_p3 = por %p72_p2, %p71_p1  ;;  %p31_p4 = scmp.ge.s32.totalorder %s2896_s28, 2 }
   0xf   : > { %s137_s6 = sadd.s32 1, %s2025_s17  ;;  %p147_p5 = scmp.ne.s32.totalorder %s2025_s17, %s2021_s16 }
  0x10   : > { %p148_p6 = scmp.eq.s32.totalorder %s1728_s25, 3  ;;  %s2898_s28 = smov (%p31_p4, %s2896_s28), 0 }
  0x11   : > { %2877 = sst [smem:[#allocation8_spill]] %s2898_s28  ;;  %p153_p8 = scmp.ne.s32.totalorder %s2021_s16, %s2017_s15 }
  0x12   : > { %p2156_p7 = por %p148_p6, %p147_p5  ;;  %s60_s8 = ssub.s32 %s2049_s23, %s2898_s28 }
  0x13   : > { %p154_p9 = scmp.eq.s32.totalorder %s1729_s26, 3  ;;  %s61_s9 = sor.u32 %s60_s8, %s59_s30 }
  0x14   : > { %p135_p10 = scmp.eq.s32.totalorder %s60_s8, 0  ;;  %p62_p11 = scmp.eq.s32.totalorder %s61_s9, 0 }
  0x15   : > { %p2164_p12 = por %p154_p9, %p153_p8  ;;  %p1731_p13 = scmp.ge.s32.totalorder %s2053_s24, 4 }
  0x16   : > { %s2169_s11 = scalar_select %p135_p10, %s2025_s17, %s137_s6  }
  0x17   : > { %s2172_s12 = scalar_select %p62_p11, %s2033_s19, %s64_s29  }
  0x18   : > { %173 = sbr.rel (%p1731_p13) target bundleno = 42 (0x2a), region = 20 }
  0x1f   : > { %186 = sbr.rel (!%p2147_p3) target bundleno = 42 (0x2a), region = 28  ;;  %s188_s13 = sand.u32 (%p2147_p3), 1, %s2033_s19  }
  0x20   : > { %s1771_s14 = sshll.u32 (%p2147_p3), %s2045_s22, 2  ;;  %s1732_s25 = sshll.u32 (%p2147_p3), %s188_s13, 3 }
  0x21   : > { %s193_s26 = sadd.s32 (%p2147_p3), %s2049_s23, %s1771_s14  ;;  %s2880_s1 = sld [smem:[#allocation9_spill]] (%p2147_p3) }
  0x22   : > { %s1735_s30 = sshll.u32 (%p2147_p3), %s193_s26, 2  ;;  %s190_s29 = scalar_lea.vmem (%p2147_p3), [#allocation3], %s1732_s25 }
  0x27   : > { %s195_s6 = scalar_lea.vmem %s2880_s1, %s1735_s30 }
  0x28   : > { %v211_v0 = vld [vmem:[%s195_s6] sm:$0xf]  ;;  %v213_v1 = vld [vmem:[%s195_s6 + $0x8] sm:$0xf] }
  0x29   : > { %212 = vst [vmem:[%s190_s29] sm:$0xf] %v211_v0  ;;  %214 = vst [vmem:[%s190_s29 + $0x4] sm:$0xf] %v213_v1 }
  0x2a PF: > { %p1736_p0 = scmp.ge.s32.totalorder %s2053_s24, 1  ;;  %p247_p1 = scmp.lt.s32.totalorder %s2053_s24, 5 }
  0x2c   : > { %p248_p2 = pnand %p1736_p0, %p247_p1 }
  0x2d   : > { %s254_s5 = sand.u32 (!%p248_p2), 1, %s2029_s18   ;;  %s2872_s13 = sand.u32 (!%p248_p2), 1, %s2021_s16  }
  0x2e   : > { %251 = sbr.rel (%p248_p2) target bundleno = 1007 (0x3ef), region = 73  ;;  %s2187_s14 = sshll.u32 (!%p248_p2), %s254_s5, 3 }
  0x2f   : > { %s2191_s25 = sshll.u32 (!%p248_p2), %s2872_s13, 3  ;;  %s1739_s26 = sshll.u32 (!%p248_p2), %s2037_s20, 1 }
  0x30   : > { %p297_p3 = scmp.lt.s32.totalorder (!%p248_p2), %s2041_s21, 1  ;;  %p290_p4 = scmp.lt.s32.totalorder (!%p248_p2), %s1739_s26, 3 }
  0x31   : > { %s256_s13 = scalar_lea.vmem (!%p248_p2), [#allocation3], %s2187_s14  ;;  %s288_s27 = scalar_lea.vmem (!%p248_p2), [#allocation4], %s2191_s25 }
  0x32   : > { %p1743_p5 = scmp.ne.s32.totalorder (!%p248_p2), %s2037_s20, 0 }
  0x35   : > { %s298_s30 = scalar_select %p297_p3, %s2041_s21, 1 }
  0x36   : > { %s2900_s26 = smov (!%p290_p4, %s1739_s26), 3  ;;  %305 = sbr.rel (%p1743_p5) target bundleno = 72 (0x48), region = 81 }
  0x37   : > { %s1742_s8 = sshll.u32 %s298_s30, 1  ;;  %s1772_s9 = sshll.u32 %s2900_s26, 3  ;;  %v2055_v2 = vmov (!%p1743_p5), 0.0  }
  0x38   : > { %s2199_s1 = scalar_lea.vmem %s2869_s3, %s1742_s8  ;;  %s2204_s28 = scalar_lea.vmem %s2866_s0, %s1772_s9  ;;  %306 = vst [vmem:[#allocation2] sm:$0xff] (!%p1743_p5), %v2055_v2  ;;  %307 = vst [vmem:[#allocation2 + $0x8] sm:$0xff] (!%p1743_p5), %v2055_v2 }
  0x39   : > { %308 = vst [vmem:[#allocation2 + $0x10] sm:$0xff] (!%p1743_p5), %v2055_v2  ;;  %309 = vst [vmem:[#allocation2 + $0x18] sm:$0xff] (!%p1743_p5), %v2055_v2 }
  0x3a   : > { %310 = vst [vmem:[#allocation2 + $0x20] sm:$0xff] (!%p1743_p5), %v2055_v2  ;;  %311 = vst [vmem:[#allocation2 + $0x28] sm:$0xff] (!%p1743_p5), %v2055_v2 }
  0x3b   : > { %312 = vst [vmem:[#allocation2 + $0x30] sm:$0xff] (!%p1743_p5), %v2055_v2  ;;  %313 = vst [vmem:[#allocation2 + $0x38] sm:$0xff] (!%p1743_p5), %v2055_v2 }
  0x3c   : > { %314 = vst [vmem:[#allocation2 + $0x40] sm:$0xff] (!%p1743_p5), %v2055_v2  ;;  %315 = vst [vmem:[#allocation2 + $0x48] sm:$0xff] (!%p1743_p5), %v2055_v2 }
  0x3d   : > { %316 = vst [vmem:[#allocation2 + $0x50] sm:$0xff] %v2055_v2  ;;  %317 = vst [vmem:[#allocation2 + $0x58] sm:$0xff] %v2055_v2 }
  0x3e   : > { %318 = vst [vmem:[#allocation2 + $0x60] sm:$0xff] %v2055_v2  ;;  %319 = vst [vmem:[#allocation2 + $0x68] sm:$0xff] %v2055_v2 }
  0x3f   : > { %320 = vst [vmem:[#allocation2 + $0x70] sm:$0xff] %v2055_v2  ;;  %321 = vst [vmem:[#allocation2 + $0x78] sm:$0xff] %v2055_v2 }
  0x40   : > { %322 = vst [vmem:[#allocation2 + $0x80] sm:$0xff] %v2055_v2  ;;  %323 = vst [vmem:[#allocation2 + $0x88] sm:$0xff] %v2055_v2 }
  0x41   : > { %324 = vst [vmem:[#allocation2 + $0x90] sm:$0xff] %v2055_v2  ;;  %325 = vst [vmem:[#allocation2 + $0x98] sm:$0xff] %v2055_v2 }
  0x42   : > { %326 = vst [vmem:[#allocation2 + $0xa0] sm:$0xff] %v2055_v2  ;;  %327 = vst [vmem:[#allocation2 + $0xa8] sm:$0xff] %v2055_v2 }
  0x43   : > { %328 = vst [vmem:[#allocation2 + $0xb0] sm:$0xff] %v2055_v2  ;;  %329 = vst [vmem:[#allocation2 + $0xb8] sm:$0xff] %v2055_v2 }
  0x44   : > { %330 = vst [vmem:[#allocation2 + $0xc0] sm:$0xff] %v2055_v2  ;;  %331 = vst [vmem:[#allocation2 + $0xc8] sm:$0xff] %v2055_v2 }
  0x45   : > { %332 = vst [vmem:[#allocation2 + $0xd0] sm:$0xff] %v2055_v2  ;;  %333 = vst [vmem:[#allocation2 + $0xd8] sm:$0xff] %v2055_v2 }
  0x46   : > { %334 = vst [vmem:[#allocation2 + $0xe0] sm:$0xff] %v2055_v2  ;;  %335 = vst [vmem:[#allocation2 + $0xe8] sm:$0xff] %v2055_v2 }
  0x47   : > { %336 = vst [vmem:[#allocation2 + $0xf0] sm:$0xff] %v2055_v2  ;;  %337 = vst [vmem:[#allocation2 + $0xf8] sm:$0xff] %v2055_v2 }
  0x48 PF: > { %v1923_v3 = vld [vmem:[%s2204_s28] ss:$8 sps:$4 sm:$0xff]   ;;  %v1925_v5 = vld [vmem:[%s2204_s28 + $0x4] ss:$8 sps:$4 sm:$0xff]   ;;  %vm422_vm0 = vcmask 130048   ;;  %v352_v58 = vld [vmem:[#allocation2 + $0x70] sm:$0xff] }
  0x49   : > { %384 = vxpose.xlu0.c.b16.start.end [1/1] (short) %v1923_v3, 128  ;;  %v1926_v4 = vld [vmem:[%s256_s13] sm:$0xff]   ;;  %v353_v61 = vld [vmem:[#allocation2 + $0x78] sm:$0xff]  ;;  %p1763_p6 = scmp.ne.s32.totalorder %s2037_s20, 1 }
  0x4a   : > { %1790 = vmatprep.subr.bf16.mxu0 %v1926_v4  ;;  %1824 = vmatprep.subr.bf16.mxu1 %v1926_v4  ;;  %v338_v23 = vld [vmem:[#allocation2] sm:$0xff]  ;;  %v339_v28 = vld [vmem:[#allocation2 + $0x8] sm:$0xff]  ;;  %s1766_s28 = sshll.u32 (!%p1763_p6), %s2041_s21, 7 }
  0x4b   : > { %1791 = vmatpush3.bf16.msra.mxu0 %v1926_v4  ;;  %1825 = vmatpush3.bf16.msra.mxu1 %v1926_v4  ;;  %v340_v22 = vld [vmem:[#allocation2 + $0x10] sm:$0xff]  ;;  %v341_v25 = vld [vmem:[#allocation2 + $0x18] sm:$0xff]  ;;  %v350_v59 = vld [vmem:[#allocation2 + $0x60] sm:$0xff]  ;;  %s2428_s9 = scalar_lea.vmem (!%p1763_p6), %s2868_s2, %s1766_s28 }
  0x4c   : > { %v342_v35 = vld [vmem:[#allocation2 + $0x20] sm:$0xff]  ;;  %v343_v40 = vld [vmem:[#allocation2 + $0x28] sm:$0xff] }
  0x4d   : > { %v344_v34 = vld [vmem:[#allocation2 + $0x30] sm:$0xff]  ;;  %v345_v37 = vld [vmem:[#allocation2 + $0x38] sm:$0xff]  ;;  %v351_v0 = vld [vmem:[#allocation2 + $0x68] sm:$0xff] }
  0x4e   : > { %v346_v47 = vld [vmem:[#allocation2 + $0x40] sm:$0xff]  ;;  %v347_v52 = vld [vmem:[#allocation2 + $0x48] sm:$0xff] }
  0x4f   : > { %v348_v46 = vld [vmem:[#allocation2 + $0x50] sm:$0xff]  ;;  %v349_v49 = vld [vmem:[#allocation2 + $0x58] sm:$0xff] }
  0x66   : > { %400 = vxpose.xlu0.c.b16.start.end [1/1] (short) %v1925_v5, 128 }
  0xaf   : > { %v392_v6 = vpop.trf.xlu0 }
  0xb0   : > { %1792 = vmatprep.mubr.msk.bf16.mxu0 %vm422_vm0, %v392_v6  ;;  %v356_v6 = vld [vmem:[#allocation2 + $0x90] sm:$0xff] }
  0xb3   : > { %v393_v7 = vpop.trf.xlu0 }
  0xb4   : > { %1793 = vmatmul.mubr.msk.bf16.vlgmr.msra.gmra.mrb[0].mxu0 %vm422_vm0, %v393_v7  ;;  %v354_v7 = vld [vmem:[#allocation2 + $0x80] sm:$0xff] }
  0xb7   : > { %v394_v8 = vpop.trf.xlu0 }
  0xb8   : > { %1796 = vmatprep.mubr.msk.bf16.mxu0 %vm422_vm0, %v394_v8 }
  0xbb   : > { %v395_v9 = vpop.trf.xlu0 }
  0xbc   : > { %1797 = vmatmul.mubr.msk.bf16.gmra.mrb[4].mxu0 %vm422_vm0, %v395_v9  ;;  %v357_v9 = vld [vmem:[#allocation2 + $0x98] sm:$0xff] }
  0xbf   : > { %v396_v10 = vpop.trf.xlu0 }
  0xc0   : > { %1800 = vmatprep.mubr.msk.bf16.mxu0 %vm422_vm0, %v396_v10 }
  0xc3   : > { %v397_v11 = vpop.trf.xlu0 }
  0xc4   : > { %1801 = vmatmul.mubr.msk.bf16.gmra.mrb[8].mxu0 %vm422_vm0, %v397_v11 }
  0xc7   : > { %v398_v12 = vpop.trf.xlu0 }
  0xc8   : > { %1804 = vmatprep.mubr.msk.bf16.mxu0 %vm422_vm0, %v398_v12  ;;  %v355_v12 = vld [vmem:[#allocation2 + $0x88] sm:$0xff] }
  0xcb   : > { %v399_v13 = vpop.trf.xlu0 }
  0xcc   : > { %1805 = vmatmul.mubr.msk.bf16.gmra.mrb[12].mxu0 %vm422_vm0, %v399_v13 }
  0xcf   : > { %v408_v14 = vpop.trf.xlu0 }
  0xd0   : > { %1808 = vmatprep.mubr.msk.bf16.mxu1 %vm422_vm0, %v408_v14 }
  0xd3   : > { %v409_v15 = vpop.trf.xlu0 }
  0xd4   : > { %1809 = vmatmul.mubr.msk.bf16.vlgmr.msra.gmra.mrb[0].mxu1 %vm422_vm0, %v409_v15 }
  0xd7   : > { %v410_v16 = vpop.trf.xlu0 }
  0xd8   : > { %1812 = vmatprep.mubr.msk.bf16.mxu1 %vm422_vm0, %v410_v16 }
  0xdb   : > { %v411_v17 = vpop.trf.xlu0 }
  0xdc   : > { %1813 = vmatmul.mubr.msk.bf16.gmra.mrb[4].mxu1 %vm422_vm0, %v411_v17 }
  0xdf   : > { %v412_v18 = vpop.trf.xlu0 }
  0xe0   : > { %1816 = vmatprep.mubr.msk.bf16.mxu1 %vm422_vm0, %v412_v18  ;;  %v360_v18 = vld [vmem:[#allocation2 + $0xb0] sm:$0xff] }
  0xe3   : > { %v413_v19 = vpop.trf.xlu0 }
  0xe4   : > { %1817 = vmatmul.mubr.msk.bf16.gmra.mrb[8].mxu1 %vm422_vm0, %v413_v19  ;;  %v358_v19 = vld [vmem:[#allocation2 + $0xa0] sm:$0xff] }
  0xe7   : > { %v414_v20 = vpop.trf.xlu0 }
  0xe8   : > { %1820 = vmatprep.mubr.msk.bf16.mxu1 %vm422_vm0, %v414_v20 }
  0xeb   : > { %v415_v21 = vpop.trf.xlu0 }
  0xec   : > { %1821 = vmatmul.mubr.msk.bf16.gmra.mrb[12].mxu1 %vm422_vm0, %v415_v21  ;;  %v361_v21 = vld [vmem:[#allocation2 + $0xb8] sm:$0xff] }
 0x187   : > { %v1794_v24 = vpop.f32.mrb[0].mxu0 }
 0x188   : > { %v634_v26 = vadd.f32 %v1794_v24, %v340_v22  ;;  %v505_v27 = vpop.f32.mrb[1].mxu0  ;;  %v359_v24 = vld [vmem:[#allocation2 + $0xa8] sm:$0xff] }
 0x189   : > { %v632_v29 = vadd.f32 %v505_v27, %v338_v23  ;;  %v1795_v30 = vpop.f32.mrb[2].mxu0 }
 0x18a   : > { %666 = vst [vmem:[#allocation2 + $0x10] sm:$0xff] %v634_v26  ;;  %v635_v31 = vadd.f32 %v1795_v30, %v341_v25  ;;  %v508_v32 = vpop.f32.mrb[3].mxu0  ;;  %v364_v30 = vld [vmem:[#allocation2 + $0xd0] sm:$0xff] }
 0x18b   : > { %664 = vst [vmem:[#allocation2] sm:$0xff] %v632_v29  ;;  %v633_v33 = vadd.f32 %v508_v32, %v339_v28 }
 0x18c   : > { %667 = vst [vmem:[#allocation2 + $0x18] sm:$0xff] %v635_v31  ;;  %v362_v31 = vld [vmem:[#allocation2 + $0xc0] sm:$0xff] }
 0x18d   : > { %665 = vst [vmem:[#allocation2 + $0x8] sm:$0xff] %v633_v33  ;;  %v365_v33 = vld [vmem:[#allocation2 + $0xd8] sm:$0xff] }
 0x18f   : > { %v1798_v36 = vpop.f32.mrb[4].mxu0 }
 0x190   : > { %v638_v38 = vadd.f32 %v1798_v36, %v344_v34  ;;  %v521_v39 = vpop.f32.mrb[5].mxu0  ;;  %v363_v36 = vld [vmem:[#allocation2 + $0xc8] sm:$0xff] }
 0x191   : > { %v636_v41 = vadd.f32 %v521_v39, %v342_v35  ;;  %v1799_v42 = vpop.f32.mrb[6].mxu0 }
 0x192   : > { %670 = vst [vmem:[#allocation2 + $0x30] sm:$0xff] %v638_v38  ;;  %v639_v43 = vadd.f32 %v1799_v42, %v345_v37  ;;  %v524_v44 = vpop.f32.mrb[7].mxu0  ;;  %v368_v42 = vld [vmem:[#allocation2 + $0xf0] sm:$0xff] }
 0x193   : > { %668 = vst [vmem:[#allocation2 + $0x20] sm:$0xff] %v636_v41  ;;  %v637_v45 = vadd.f32 %v524_v44, %v343_v40 }
 0x194   : > { %671 = vst [vmem:[#allocation2 + $0x38] sm:$0xff] %v639_v43  ;;  %v366_v43 = vld [vmem:[#allocation2 + $0xe0] sm:$0xff] }
 0x195   : > { %669 = vst [vmem:[#allocation2 + $0x28] sm:$0xff] %v637_v45  ;;  %v369_v45 = vld [vmem:[#allocation2 + $0xf8] sm:$0xff] }
 0x197   : > { %v1802_v48 = vpop.f32.mrb[8].mxu0 }
 0x198   : > { %v642_v50 = vadd.f32 %v1802_v48, %v348_v46  ;;  %v537_v51 = vpop.f32.mrb[9].mxu0  ;;  %v367_v48 = vld [vmem:[#allocation2 + $0xe8] sm:$0xff] }
 0x199   : > { %v640_v53 = vadd.f32 %v537_v51, %v346_v47  ;;  %v1803_v54 = vpop.f32.mrb[10].mxu0 }
 0x19a   : > { %674 = vst [vmem:[#allocation2 + $0x50] sm:$0xff] %v642_v50  ;;  %v643_v55 = vadd.f32 %v1803_v54, %v349_v49  ;;  %v540_v56 = vpop.f32.mrb[11].mxu0  ;;  %v2233_v54 = vld [vmem:[%s2868_s2 + $0x10] sm:$0xff] (!%p1763_p6) }
 0x19b   : > { %672 = vst [vmem:[#allocation2 + $0x40] sm:$0xff] %v640_v53  ;;  %v641_v57 = vadd.f32 %v540_v56, %v347_v52  ;;  %v2056_v56 = vmov (!%p1763_p6), 0  }
 0x19c   : > { %675 = vst [vmem:[#allocation2 + $0x58] sm:$0xff] %v643_v55  ;;  %v2238_v55 = vld [vmem:[%s2868_s2] sm:$0xff] (!%p1763_p6)  ;;  %1928 = vset.pattern.permute.xlu1 (!%p1763_p6), %v2056_v56  ;;  %1927 = vset.pattern.permute.xlu0 (!%p1763_p6), %v2056_v56 }
 0x19d   : > { %673 = vst [vmem:[#allocation2 + $0x48] sm:$0xff] %v641_v57  ;;  %778 = vperm.xlu1 (!%p1763_p6), %1928, %v2233_v54   ;;  %768 = vperm.xlu0 (!%p1763_p6), %1927, %v2238_v55   ;;  %v2247_v57 = vld [vmem:[%s2868_s2 + $0x18] sm:$0xff] (!%p1763_p6) }
 0x19f   : > { %v1806_v60 = vpop.f32.mrb[12].mxu0 }
 0x1a0   : > { %v646_v62 = vadd.f32 %v1806_v60, %v352_v58  ;;  %v553_v63 = vpop.f32.mrb[13].mxu0  ;;  %v2252_v58 = vld [vmem:[%s2868_s2 + $0x8] sm:$0xff] (!%p1763_p6)  ;;  %v2264_v60 = vld [vmem:[%s2868_s2 + $0x20] sm:$0xff] (!%p1763_p6) }
 0x1a1   : > { %v644_v1 = vadd.f32 %v553_v63, %v350_v59  ;;  %v1807_v2 = vpop.f32.mrb[14].mxu0  ;;  %783 = vperm.xlu1 (!%p1763_p6), %1928, %v2247_v57   ;;  %773 = vperm.xlu0 (!%p1763_p6), %1927, %v2252_v58   ;;  %v2259_v59 = vld [vmem:[%s2868_s2 + $0x28] sm:$0xff] (!%p1763_p6) }
 0x1a2   : > { %678 = vst [vmem:[#allocation2 + $0x70] sm:$0xff] %v646_v62  ;;  %v647_v3 = vadd.f32 %v1807_v2, %v353_v61  ;;  %v556_v4 = vpop.f32.mrb[15].mxu0  ;;  %v2271_v61 = vld [vmem:[%s2868_s2 + $0x38] sm:$0xff] (!%p1763_p6)  ;;  %v2276_v62 = vld [vmem:[%s2868_s2 + $0x30] sm:$0xff] (!%p1763_p6)  ;;  %v2283_v63 = vld [vmem:[%s2868_s2 + $0x48] sm:$0xff] (!%p1763_p6) }
 0x1a3   : > { %676 = vst [vmem:[#allocation2 + $0x60] sm:$0xff] %v644_v1  ;;  %v645_v5 = vadd.f32 %v556_v4, %v351_v0  ;;  %v2288_v0 = vld [vmem:[%s2868_s2 + $0x40] sm:$0xff] (!%p1763_p6)  ;;  %v2295_v1 = vld [vmem:[%s2868_s2 + $0x58] sm:$0xff] (!%p1763_p6)  ;;  %v2300_v2 = vld [vmem:[%s2868_s2 + $0x50] sm:$0xff] (!%p1763_p6) }
 0x1a4   : > { %679 = vst [vmem:[#allocation2 + $0x78] sm:$0xff] %v647_v3  ;;  %v2307_v3 = vld [vmem:[%s2868_s2 + $0x68] sm:$0xff] (!%p1763_p6)  ;;  %v2312_v4 = vld [vmem:[%s2868_s2 + $0x60] sm:$0xff] (!%p1763_p6) }
 0x1a5   : > { %677 = vst [vmem:[#allocation2 + $0x68] sm:$0xff] %v645_v5  ;;  %793 = vperm.xlu1 (!%p1763_p6), %1928, %v2259_v59   ;;  %788 = vperm.xlu0 (!%p1763_p6), %1927, %v2264_v60   ;;  %v2319_v5 = vld [vmem:[%s2868_s2 + $0x78] sm:$0xff] (!%p1763_p6) }
 0x1a7   : > { %v1810_v8 = vpop.f32.mrb[0].mxu1 }
 0x1a8   : > { %v650_v10 = vadd.f32 %v1810_v8, %v356_v6  ;;  %v569_v11 = vpop.f32.mrb[1].mxu1  ;;  %v2324_v6 = vld [vmem:[%s2868_s2 + $0x70] sm:$0xff] (!%p1763_p6)  ;;  %v2336_v8 = vld [vmem:[%s2868_s2 + $0x80] sm:$0xff] (!%p1763_p6) }
 0x1a9   : > { %v648_v13 = vadd.f32 %v569_v11, %v354_v7  ;;  %v1811_v14 = vpop.f32.mrb[2].mxu1  ;;  %803 = vperm.xlu1 (!%p1763_p6), %1928, %v2271_v61   ;;  %798 = vperm.xlu0 (!%p1763_p6), %1927, %v2276_v62   ;;  %v2331_v7 = vld [vmem:[%s2868_s2 + $0x88] sm:$0xff] (!%p1763_p6) }
 0x1aa   : > { %682 = vst [vmem:[#allocation2 + $0x90] sm:$0xff] %v650_v10  ;;  %v651_v15 = vadd.f32 %v1811_v14, %v357_v9  ;;  %v572_v16 = vpop.f32.mrb[3].mxu1  ;;  %v2343_v9 = vld [vmem:[%s2868_s2 + $0x98] sm:$0xff] (!%p1763_p6)  ;;  %v2348_v10 = vld [vmem:[%s2868_s2 + $0x90] sm:$0xff] (!%p1763_p6)  ;;  %v2355_v11 = vld [vmem:[%s2868_s2 + $0xa8] sm:$0xff] (!%p1763_p6) }
 0x1ab   : > { %680 = vst [vmem:[#allocation2 + $0x80] sm:$0xff] %v648_v13  ;;  %v649_v17 = vadd.f32 %v572_v16, %v355_v12  ;;  %v2360_v12 = vld [vmem:[%s2868_s2 + $0xa0] sm:$0xff] (!%p1763_p6)  ;;  %v2367_v13 = vld [vmem:[%s2868_s2 + $0xb8] sm:$0xff] (!%p1763_p6)  ;;  %v2372_v14 = vld [vmem:[%s2868_s2 + $0xb0] sm:$0xff] (!%p1763_p6) }
 0x1ac   : > { %683 = vst [vmem:[#allocation2 + $0x98] sm:$0xff] %v651_v15  ;;  %v2379_v15 = vld [vmem:[%s2868_s2 + $0xc8] sm:$0xff] (!%p1763_p6)  ;;  %v2384_v16 = vld [vmem:[%s2868_s2 + $0xc0] sm:$0xff] (!%p1763_p6) }
 0x1ad   : > { %681 = vst [vmem:[#allocation2 + $0x88] sm:$0xff] %v649_v17  ;;  %813 = vperm.xlu1 (!%p1763_p6), %1928, %v2283_v63   ;;  %808 = vperm.xlu0 (!%p1763_p6), %1927, %v2288_v0   ;;  %v2391_v17 = vld [vmem:[%s2868_s2 + $0xd8] sm:$0xff] (!%p1763_p6) }
 0x1af   : > { %v1814_v20 = vpop.f32.mrb[4].mxu1 }
 0x1b0   : > { %v654_v22 = vadd.f32 %v1814_v20, %v360_v18  ;;  %v585_v23 = vpop.f32.mrb[5].mxu1  ;;  %v2396_v18 = vld [vmem:[%s2868_s2 + $0xd0] sm:$0xff] (!%p1763_p6)  ;;  %v2408_v20 = vld [vmem:[%s2868_s2 + $0xe0] sm:$0xff] (!%p1763_p6) }
 0x1b1   : > { %v652_v25 = vadd.f32 %v585_v23, %v358_v19  ;;  %v1815_v26 = vpop.f32.mrb[6].mxu1  ;;  %823 = vperm.xlu1 (!%p1763_p6), %1928, %v2295_v1   ;;  %818 = vperm.xlu0 (!%p1763_p6), %1927, %v2300_v2   ;;  %v2403_v19 = vld [vmem:[%s2868_s2 + $0xe8] sm:$0xff] (!%p1763_p6) }
 0x1b2   : > { %686 = vst [vmem:[#allocation2 + $0xb0] sm:$0xff] %v654_v22  ;;  %v655_v27 = vadd.f32 %v1815_v26, %v361_v21  ;;  %v588_v28 = vpop.f32.mrb[7].mxu1  ;;  %v2416_v21 = vld [vmem:[%s2868_s2 + $0xf8] sm:$0xff] (!%p1763_p6)  ;;  %v2421_v22 = vld [vmem:[%s2868_s2 + $0xf0] sm:$0xff] (!%p1763_p6)  ;;  %v1283_v23 = vld [vmem:[%s2428_s9 + $0x8] sm:$0xff] (!%p1763_p6) }
 0x1b3   : > { %684 = vst [vmem:[#allocation2 + $0xa0] sm:$0xff] %v652_v25  ;;  %v653_v29 = vadd.f32 %v588_v28, %v359_v24  ;;  %v2057_v24 = vmov (!%p1763_p6), 1   ;;  %v1288_v25 = vld [vmem:[%s2428_s9 + $0x30] sm:$0xff] (!%p1763_p6)  ;;  %v1289_v26 = vld [vmem:[%s2428_s9 + $0x38] sm:$0xff] (!%p1763_p6) }
 0x1b4   : > { %687 = vst [vmem:[#allocation2 + $0xb8] sm:$0xff] %v655_v27  ;;  %v2440_v27 = vld [vmem:[%s2428_s9 + $0x50] sm:$0xff] (!%p1763_p6)  ;;  %v2445_v28 = vld [vmem:[%s2428_s9 + $0x58] sm:$0xff] (!%p1763_p6) }
 0x1b5   : > { %685 = vst [vmem:[#allocation2 + $0xa8] sm:$0xff] %v653_v29  ;;  %833 = vperm.xlu1 (!%p1763_p6), %1928, %v2307_v3   ;;  %828 = vperm.xlu0 (!%p1763_p6), %1927, %v2312_v4   ;;  %v2450_v29 = vld [vmem:[%s2428_s9 + $0x70] sm:$0xff] (!%p1763_p6) }
 0x1b7   : > { %v1818_v32 = vpop.f32.mrb[8].mxu1 }
 0x1b8   : > { %v658_v34 = vadd.f32 %v1818_v32, %v364_v30  ;;  %v601_v35 = vpop.f32.mrb[9].mxu1  ;;  %v2455_v30 = vld [vmem:[%s2428_s9 + $0x78] sm:$0xff] (!%p1763_p6)  ;;  %v1284_v32 = vld [vmem:[%s2428_s9 + $0x10] sm:$0xff] (!%p1763_p6) }
 0x1b9   : > { %v656_v37 = vadd.f32 %v601_v35, %v362_v31  ;;  %v1819_v38 = vpop.f32.mrb[10].mxu1  ;;  %843 = vperm.xlu1 (!%p1763_p6), %1928, %v2319_v5   ;;  %838 = vperm.xlu0 (!%p1763_p6), %1927, %v2324_v6   ;;  %v1282_v31 = vld [vmem:[%s2428_s9] sm:$0xff] (!%p1763_p6)  ;;  %v1287_v35 = vld [vmem:[%s2428_s9 + $0x28] sm:$0xff] (!%p1763_p6) }
 0x1ba   : > { %690 = vst [vmem:[#allocation2 + $0xd0] sm:$0xff] %v658_v34  ;;  %v659_v39 = vadd.f32 %v1819_v38, %v365_v33  ;;  %v604_v40 = vpop.f32.mrb[11].mxu1  ;;  %v1285_v33 = vld [vmem:[%s2428_s9 + $0x18] sm:$0xff] (!%p1763_p6)  ;;  %v1286_v34 = vld [vmem:[%s2428_s9 + $0x20] sm:$0xff] (!%p1763_p6) }
 0x1bb   : > { %688 = vst [vmem:[#allocation2 + $0xc0] sm:$0xff] %v656_v37  ;;  %v657_v41 = vadd.f32 %v604_v40, %v363_v36  ;;  %v1290_v40 = vld [vmem:[%s2428_s9 + $0x40] sm:$0xff] (!%p1763_p6) }
 0x1bc   : > { %691 = vst [vmem:[#allocation2 + $0xd8] sm:$0xff] %v659_v39 }
 0x1bd   : > { %689 = vst [vmem:[#allocation2 + $0xc8] sm:$0xff] %v657_v41  ;;  %853 = vperm.xlu1 (!%p1763_p6), %1928, %v2331_v7   ;;  %848 = vperm.xlu0 (!%p1763_p6), %1927, %v2336_v8  }
 0x1bf   : > { %v1822_v44 = vpop.f32.mrb[12].mxu1  ;;  %699 = sbr.rel (%p1763_p6) target bundleno = 982 (0x3d6), region = 85 }
 0x1c0   : > { %v662_v46 = vadd.f32 %v1822_v44, %v368_v42  ;;  %v617_v47 = vpop.f32.mrb[13].mxu1 }
 0x1c1   : > { %v660_v49 = vadd.f32 %v617_v47, %v366_v43  ;;  %v1823_v50 = vpop.f32.mrb[14].mxu1  ;;  %863 = vperm.xlu1 (!%p1763_p6), %1928, %v2343_v9   ;;  %858 = vperm.xlu0 (!%p1763_p6), %1927, %v2348_v10  }
 0x1c2   : > { %694 = vst [vmem:[#allocation2 + $0xf0] sm:$0xff] %v662_v46  ;;  %v663_v51 = vadd.f32 %v1823_v50, %v369_v45  ;;  %v620_v52 = vpop.f32.mrb[15].mxu1  ;;  %v1291_v45 = vld [vmem:[%s2428_s9 + $0x48] sm:$0xff] (!%p1763_p6) }
 0x1c3   : > { %692 = vst [vmem:[#allocation2 + $0xe0] sm:$0xff] %v660_v49  ;;  %v661_v53 = vadd.f32 %v620_v52, %v367_v48 }
 0x1c4   : > { %695 = vst [vmem:[#allocation2 + $0xf8] sm:$0xff] %v663_v51 }
 0x1c5   : > { %693 = vst [vmem:[#allocation2 + $0xe8] sm:$0xff] %v661_v53  ;;  %873 = vperm.xlu1 (!%p1763_p6), %1928, %v2355_v11   ;;  %868 = vperm.xlu0 (!%p1763_p6), %1927, %v2360_v12  }
 0x1c9   : > { %883 = vperm.xlu1 %1928, %v2367_v13   ;;  %878 = vperm.xlu0 %1927, %v2372_v14  }
 0x1cd   : > { %893 = vperm.xlu1 %1928, %v2379_v15   ;;  %888 = vperm.xlu0 %1927, %v2384_v16  }
 0x1d1   : > { %903 = vperm.xlu1 %1928, %v2391_v17   ;;  %898 = vperm.xlu0 %1927, %v2396_v18  }
 0x1d5   : > { %913 = vperm.xlu1 %1928, %v2403_v19   ;;  %908 = vperm.xlu0 %1927, %v2408_v20  }
 0x1d9   : > { %923 = vperm.xlu1 %1928, %v2416_v21   ;;  %918 = vperm.xlu0 %1927, %v2421_v22  }
 0x1dd   : > { %1929 = vset.pattern.permute.xlu1 %v2057_v24  ;;  %1305 = vperm.xlu0 %1927, %v1283_v23  }
 0x1de   : > { %999 = vperm.xlu1 %1929, %v2252_v58  }
 0x1e1   : > { %1330 = vperm.xlu0 %1927, %v1288_v25  }
 0x1e2   : > { %1003 = vperm.xlu1 %1929, %v2233_v54  }
 0x1e5   : > { %1335 = vperm.xlu0 %1927, %v1289_v26  }
 0x1e6   : > { %1011 = vperm.xlu1 %1929, %v2264_v60  }
 0x1e9   : > { %1350 = vperm.xlu0 %1927, %v2440_v27  }
 0x1ea   : > { %1019 = vperm.xlu1 %1929, %v2276_v62  }
 0x1ed   : > { %1355 = vperm.xlu0 %1927, %v2445_v28  }
 0x1ee   : > { %1027 = vperm.xlu1 %1929, %v2288_v0   ;;  %v1295_v0 = vld [vmem:[%s2428_s9 + $0x68] sm:$0xff] }
 0x1f1   : > { %1370 = vperm.xlu0 %1927, %v2450_v29  }
 0x1f2   : > { %1035 = vperm.xlu1 %1929, %v2300_v2  }
 0x1f5   : > { %1375 = vperm.xlu0 %1927, %v2455_v30  }
 0x1f6   : > { %1930 = vset.pattern.permute.xlu1 %v2056_v56 }
 0x1f7   : > { %1300 = vperm.xlu1 %1930, %v1282_v31  }
 0x1f9   : > { %1942 = vset.pattern.permute.xlu0 %v2057_v24 }
 0x1fa   : > { %995 = vperm.xlu0 %1942, %v2238_v55  }
 0x1fb   : > { %1310 = vperm.xlu1 %1930, %v1284_v32  }
 0x1fe   : > { %1007 = vperm.xlu0 %1942, %v2247_v57  }
 0x1ff   : > { %1315 = vperm.xlu1 %1930, %v1285_v33  }
 0x202   : > { %1015 = vperm.xlu0 %1942, %v2259_v59   ;;  %v1294_v59 = vld [vmem:[%s2428_s9 + $0x60] sm:$0xff] }
 0x203   : > { %1931 = vset.pattern.permute.xlu1 %v2057_v24 }
 0x204   : > { %1415 = vperm.xlu1 %1931, %v1283_v23  }
 0x206   : > { %1023 = vperm.xlu0 %1942, %v2271_v61  }
 0x208   : > { %1932 = vset.pattern.permute.xlu1 %v2056_v56 }
 0x209   : > { %1320 = vperm.xlu1 %1932, %v1286_v34  }
 0x20a   : > { %1031 = vperm.xlu0 %1942, %v2283_v63  }
 0x20d   : > { %1325 = vperm.xlu1 %1932, %v1287_v35  }
 0x20e   : > { %1039 = vperm.xlu0 %1942, %v2295_v1  }
 0x211   : > { %1933 = vset.pattern.permute.xlu1 %v2057_v24 }
 0x212   : > { %1043 = vperm.xlu1 %1933, %v2312_v4   ;;  %1411 = vperm.xlu0 %1942, %v1282_v31  }
 0x216   : > { %1427 = vperm.xlu1 %1933, %v1286_v34   ;;  %1419 = vperm.xlu0 %1942, %v1284_v32  }
 0x21a   : > { %1047 = vperm.xlu1 %1933, %v2307_v3   ;;  %1423 = vperm.xlu0 %1942, %v1285_v33  }
 0x21c   : > { %v2476_v36 = vpop.permute.xlu1 %778  ;;  %v2478_v37 = vpop.permute.xlu0 %768 }
 0x21e   : > { %1431 = vperm.xlu1 %1933, %v1287_v35   ;;  %1051 = vperm.xlu0 %1942, %v2324_v6   ;;  %v710_v35 = vld [vmem:[#allocation2 + $0x40] sm:$0xff] }
 0x220   : > { %v2481_v38 = vpop.permute.xlu1 %783  ;;  %v2483_v39 = vpop.permute.xlu0 %773 }
 0x222   : > { %1934 = vset.pattern.permute.xlu1 %v2056_v56  ;;  %1055 = vperm.xlu0 %1942, %v2319_v5  }
 0x223   : > { %1340 = vperm.xlu1 %1934, %v1290_v40  }
 0x224   : > { %v2488_v41 = vpop.permute.xlu1 %793  ;;  %v2490_v42 = vpop.permute.xlu0 %788 }
 0x226   : > { %1439 = vperm.xlu0 %1942, %v1289_v26  }
 0x227   : > { %1935 = vset.pattern.permute.xlu1 %v2057_v24 }
 0x228   : > { %v2493_v43 = vpop.permute.xlu1 %803  ;;  %1435 = vperm.xlu1 %1935, %v1288_v25   ;;  %v2495_v44 = vpop.permute.xlu0 %798 }
 0x22a   : > { %1067 = vperm.xlu0 %1942, %v2348_v10   ;;  %v703_v10 = vld [vmem:[#allocation2 + $0x8] sm:$0xff] }
 0x22c   : > { %v2499_v46 = vpop.permute.xlu1 %813  ;;  %1936 = vset.pattern.permute.xlu1 %v2056_v56  ;;  %v2502_v47 = vpop.permute.xlu0 %808 }
 0x22d   : > { %1345 = vperm.xlu1 %1936, %v1291_v45  }
 0x22e   : > { %1071 = vperm.xlu0 %1942, %v2343_v9  }
 0x230   : > { %v2505_v48 = vpop.permute.xlu1 %823  ;;  %v2507_v49 = vpop.permute.xlu0 %818 }
 0x231   : > { %1937 = vset.pattern.permute.xlu1 %v2057_v24 }
 0x232   : > { %1059 = vperm.xlu1 %1937, %v2336_v8   ;;  %1455 = vperm.xlu0 %1942, %v2445_v28   ;;  %v708_v28 = vld [vmem:[#allocation2 + $0x30] sm:$0xff] }
 0x234   : > { %v2512_v50 = vpop.permute.xlu1 %833  ;;  %v2514_v51 = vpop.permute.xlu0 %828 }
 0x236   : > { %1443 = vperm.xlu1 %1937, %v1290_v40   ;;  %1083 = vperm.xlu0 %1942, %v2372_v14  }
 0x238   : > { %v2517_v52 = vpop.permute.xlu1 %843  ;;  %v2519_v53 = vpop.permute.xlu0 %838 }
 0x23a   : > { %1063 = vperm.xlu1 %1937, %v2331_v7   ;;  %1471 = vperm.xlu0 %1942, %v2455_v30   ;;  %v2564_v7 = vld [vmem:[%s2199_s1] ss:$0 sm:$0xff] }
 0x23b   : > { %v936_v25 = vmul.f32 %v2564_v7, %v2495_v44  ;;  %v938_v31 = vmul.f32 %v2564_v7, %v2502_v47 }
 0x23c   : > { %v2523_v54 = vpop.permute.xlu1 %853  ;;  %v2525_v55 = vpop.permute.xlu0 %848 }
 0x23d   : > { %v968_v33 = vsub.f32 %v708_v28, %v936_v25 }
 0x23e   : > { %1447 = vperm.xlu1 %1937, %v1291_v45   ;;  %1095 = vperm.xlu0 %1942, %v2379_v15   ;;  %v712_v45 = vld [vmem:[#allocation2 + $0x50] sm:$0xff] }
 0x240   : > { %v2528_v57 = vpop.permute.xlu1 %863  ;;  %v2530_v58 = vpop.permute.xlu0 %858 }
 0x242   : > { %1938 = vset.pattern.permute.xlu1 %v2056_v56  ;;  %1103 = vperm.xlu0 %1942, %v2391_v17  }
 0x243   : > { %1360 = vperm.xlu1 %1938, %v1294_v59  }
 0x244   : > { %v2535_v60 = vpop.permute.xlu1 %873  ;;  %v2537_v61 = vpop.permute.xlu0 %868 }
 0x246   : > { %1111 = vperm.xlu0 %1942, %v2403_v19   ;;  %v934_v19 = vmul.f32 %v2564_v7, %v2490_v42  ;;  %v970_v42 = vsub.f32 %v710_v35, %v938_v31 }
 0x247   : > { %1939 = vset.pattern.permute.xlu1 %v2057_v24 }
 0x248   : > { %v2541_v62 = vpop.permute.xlu1 %883  ;;  %1451 = vperm.xlu1 %1939, %v2440_v27   ;;  %v2544_v63 = vpop.permute.xlu0 %878 }
 0x24a   : > { %1119 = vperm.xlu0 %1942, %v2416_v21  }
 0x24c   : > { %v2548_v1 = vpop.permute.xlu1 %893  ;;  %1940 = vset.pattern.permute.xlu1 %v2056_v56  ;;  %v2551_v2 = vpop.permute.xlu0 %888  ;;  %v931_v56 = vmul.f32 %v2564_v7, %v2483_v39  ;;  %v940_v39 = vmul.f32 %v2564_v7, %v2507_v49  ;;  %v704_v49 = vld [vmem:[#allocation2 + $0x10] sm:$0xff] }
 0x24d   : > { %1365 = vperm.xlu1 %1940, %v1295_v0  }
 0x250   : > { %v2553_v3 = vpop.permute.xlu1 %903  ;;  %v2555_v4 = vpop.permute.xlu0 %898 }
 0x251   : > { %1941 = vset.pattern.permute.xlu1 %v2057_v24  ;;  %v706_v24 = vld [vmem:[#allocation2 + $0x20] sm:$0xff] }
 0x252   : > { %1075 = vperm.xlu1 %1941, %v2360_v12   ;;  %v963_v12 = vsub.f32 %v703_v10, %v931_v56  ;;  %v932_v56 = vmul.f32 %v2564_v7, %v2476_v36  ;;  %v930_v10 = vmul.f32 %v2564_v7, %v2478_v37  ;;  %v933_v36 = vmul.f32 %v2564_v7, %v2481_v38 }
 0x254   : > { %v2559_v5 = vpop.permute.xlu1 %913  ;;  %v2561_v6 = vpop.permute.xlu0 %908 }
 0x256   : > { %1459 = vperm.xlu1 %1941, %v1294_v59   ;;  %v972_v59 = vsub.f32 %v712_v45, %v940_v39  ;;  %v707_v39 = vld [vmem:[#allocation2 + $0x28] sm:$0xff] }
 0x258   : > { %v2568_v8 = vpop.permute.xlu1 %923  ;;  %v2570_v9 = vpop.permute.xlu0 %918 }
 0x25a   : > { %1079 = vperm.xlu1 %1941, %v2355_v11   ;;  %v966_v11 = vsub.f32 %v706_v24, %v934_v19  ;;  %v964_v19 = vsub.f32 %v704_v49, %v932_v56  ;;  %v2610_v24 = vld [vmem:[%s2199_s1 + $0x1] ss:$0 sm:$0xff]  ;;  %s2645_s1 = scalar_lea.vmem [#allocation2], %s1766_s28 }
 0x25c   : > { %v2573_v14 = vpop.permute.xlu0 %1305 }
 0x25d   : > { %v1000_v15 = vpop.permute.xlu1 %999 }
 0x25e   : > { %v1123_v17 = vmul.f32 %v1000_v15, %v963_v12  ;;  %1463 = vperm.xlu1 %1941, %v1295_v0   ;;  %v702_v15 = vld [vmem:[#allocation2] sm:$0xff] }
 0x260   : > { %v2577_v21 = vpop.permute.xlu0 %1330  ;;  %v1159_v28 = vmul.f32 %v2610_v24, %v1123_v17  ;;  %v937_v17 = vmul.f32 %v2564_v7, %v2493_v43 }
 0x261   : > { %v1004_v23 = vpop.permute.xlu1 %1003 }
 0x262   : > { %1467 = vperm.xlu1 %1941, %v2450_v29   ;;  %v1124_v25 = vmul.f32 %v1004_v23, %v964_v19  ;;  %v1191_v38 = vmul.f32 %v1159_v28, %v1159_v28 }
 0x264   : > { %v2582_v26 = vpop.permute.xlu0 %1335 }
 0x265   : > { %v1012_v27 = vpop.permute.xlu1 %1011 }
 0x266   : > { %v1126_v30 = vmul.f32 %v1012_v27, %v966_v11  ;;  %1087 = vperm.xlu1 %1941, %v2367_v13   ;;  %v962_v11 = vsub.f32 %v702_v15, %v930_v10  ;;  %v705_v27 = vld [vmem:[#allocation2 + $0x18] sm:$0xff] }
 0x267   : > { %v965_v35 = vsub.f32 %v705_v27, %v933_v36  ;;  %v709_v10 = vld [vmem:[#allocation2 + $0x38] sm:$0xff] }
 0x268   : > { %v2587_v32 = vpop.permute.xlu0 %1350  ;;  %v1162_v56 = vmul.f32 %v2610_v24, %v1126_v30  ;;  %v969_v27 = vsub.f32 %v709_v10, %v937_v17  ;;  %v711_v30 = vld [vmem:[#allocation2 + $0x48] sm:$0xff] }
 0x269   : > { %v1020_v34 = vpop.permute.xlu1 %1019 }
 0x26a   : > { %v1128_v29 = vmul.f32 %v1020_v34, %v968_v33  ;;  %1091 = vperm.xlu1 %1941, %v2384_v16   ;;  %v935_v33 = vmul.f32 %v2564_v7, %v2488_v41  ;;  %v1194_v28 = vmul.f32 %v1162_v56, %v1162_v56 }
 0x26c   : > { %v2592_v40 = vpop.permute.xlu0 %1355  ;;  %v1164_v43 = vmul.f32 %v2610_v24, %v1128_v29 }
 0x26d   : > { %v1028_v44 = vpop.permute.xlu1 %1027 }
 0x26e   : > { %v1130_v13 = vmul.f32 %v1028_v44, %v970_v42  ;;  %1099 = vperm.xlu1 %1941, %v2396_v18  }
 0x270   : > { %v2595_v47 = vpop.permute.xlu0 %1370 }
 0x271   : > { %v1036_v0 = vpop.permute.xlu1 %1035 }
 0x272   : > { %v2599_v16 = vmul.f32 %v1036_v0, %v972_v59  ;;  %1107 = vperm.xlu1 %1941, %v2408_v20   ;;  %v967_v59 = vsub.f32 %v707_v39, %v935_v33 }
 0x274   : > { %v2604_v12 = vpop.permute.xlu0 %1375 }
 0x276   : > { %1115 = vperm.xlu1 %1941, %v2421_v22   ;;  %v2607_v18 = vpop.permute.xlu1 %1300  ;;  %v1160_v22 = vmul.f32 %v2610_v24, %v1124_v25 }
 0x278   : > { %v1192_v0 = vmul.f32 %v1160_v22, %v1160_v22 }
 0x279   : > { %v996_v20 = vpop.permute.xlu0 %995 }
 0x27a   : > { %v1122_v37 = vmul.f32 %v996_v20, %v962_v11  ;;  %v2615_v31 = vpop.permute.xlu1 %1310  ;;  %v939_v11 = vmul.f32 %v2564_v7, %v2499_v46  ;;  %v1166_v46 = vmul.f32 %v2610_v24, %v1130_v13  ;;  %v1168_v13 = vmul.f32 %v2610_v24, %v2599_v16 }
 0x27c   : > { %v1158_v34 = vmul.f32 %v2610_v24, %v1122_v37 }
 0x27d   : > { %v1008_v42 = vpop.permute.xlu0 %1007 }
 0x27e   : > { %v1190_v23 = vmul.f32 %v1158_v34, %v1158_v34  ;;  %v1125_v44 = vmul.f32 %v1008_v42, %v965_v35  ;;  %v2621_v45 = vpop.permute.xlu1 %1315  ;;  %v941_v42 = vmul.f32 %v2564_v7, %v2505_v48  ;;  %v942_v48 = vmul.f32 %v2564_v7, %v2514_v51 }
 0x280   : > { %v1222_v41 = vadd.f32 %v1191_v38, %v1190_v23  ;;  %v1161_v49 = vmul.f32 %v2610_v24, %v1125_v44  ;;  %v971_v38 = vsub.f32 %v711_v30, %v939_v11  ;;  %v1196_v23 = vmul.f32 %v1164_v43, %v1164_v43  ;;  %v714_v43 = vld [vmem:[#allocation2 + $0x60] sm:$0xff] }
 0x281   : > { %v1016_v15 = vpop.permute.xlu0 %1015 }
 0x282   : > { %v1193_v19 = vmul.f32 %v1161_v49, %v1161_v49  ;;  %v1223_v36 = vadd.f32 %v1222_v41, %v1192_v0  ;;  %v1127_v25 = vmul.f32 %v1016_v15, %v967_v59  ;;  %v713_v59 = vld [vmem:[#allocation2 + $0x58] sm:$0xff]  ;;  %v1506_v0 = vlaneseq }
 0x283   : > { %v1416_v20 = vpop.permute.xlu1 %1415  ;;  %v1379_v41 = vmul.f32 %v2564_v7, %v2573_v14  ;;  %v1378_v14 = vmul.f32 %v2564_v7, %v2607_v18  ;;  %v974_v18 = vsub.f32 %v714_v43, %v942_v48 }
 0x284   : > { %v1224_v37 = vadd.f32 %v1223_v36, %v1193_v19  ;;  %v1163_v33 = vmul.f32 %v2610_v24, %v1127_v25  ;;  %v1266_v19 = vld [vmem:[%s2645_s1 + $0x8] sm:$0xff]  ;;  %v973_v36 = vsub.f32 %v713_v59, %v941_v42  ;;  %v1198_v25 = vmul.f32 %v1166_v46, %v1166_v46 }
 0x285   : > { %v1024_v22 = vpop.permute.xlu0 %1023  ;;  %v2651_v51 = vshrl.u32 %v1506_v0, 7  ;;  %v2656_v42 = vand.u32 127, %v1506_v0 }
 0x286   : > { %v1195_v34 = vmul.f32 %v1163_v33, %v1163_v33  ;;  %v1225_v35 = vadd.f32 %v1224_v37, %v1194_v28  ;;  %v1129_v39 = vmul.f32 %v1024_v22, %v969_v27  ;;  %v1265_v37 = vld [vmem:[%s2645_s1] sm:$0xff]  ;;  %v1395_v33 = vsub.f32 %v1266_v19, %v1379_v41 }
 0x287   : > { %v1508_v59 = vadd.s32 8, %v2651_v51  ;;  %vm1525_vm1 = vcmp.eq.s32.totalorder %v2651_v51, %v2656_v42  ;;  %v1509_v48 = vadd.s32 16, %v2651_v51 }
 0x288   : > { %v1226_v44 = vadd.f32 %v1225_v35, %v1195_v34  ;;  %v1165_v17 = vmul.f32 %v2610_v24, %v1129_v39  ;;  %v2635_v29 = vpop.permute.xlu1 %1320  ;;  %v1200_v35 = vmul.f32 %v1168_v13, %v1168_v13  ;;  %v1380_v39 = vmul.f32 %v2564_v7, %v2615_v31 }
 0x289   : > { %v1032_v56 = vpop.permute.xlu0 %1031  ;;  %vm1526_vm2 = vcmp.eq.s32.totalorder %v1508_v59, %v2656_v42  ;;  %vm1527_vm3 = vcmp.eq.s32.totalorder %v1509_v48, %v2656_v42  ;;  %v716_v59 = vld [vmem:[#allocation2 + $0x70] sm:$0xff] }
 0x28a   : > { %v1197_v49 = vmul.f32 %v1165_v17, %v1165_v17  ;;  %v1227_v10 = vadd.f32 %v1226_v44, %v1196_v23  ;;  %v1131_v15 = vmul.f32 %v1032_v56, %v971_v38  ;;  %v1475_v38 = vmul.f32 %v1416_v20, %v1395_v33  ;;  %v1267_v17 = vld [vmem:[%s2645_s1 + $0x10] sm:$0xff] }
 0x28b   : > { %v1394_v44 = vsub.f32 %v1265_v37, %v1378_v14  ;;  %v943_v20 = vmul.f32 %v2564_v7, %v2512_v50  ;;  %v1396_v13 = vsub.f32 %v1267_v17, %v1380_v39  ;;  %v944_v33 = vmul.f32 %v2564_v7, %v2519_v53 }
 0x28c   : > { %v1228_v11 = vadd.f32 %v1227_v10, %v1197_v49  ;;  %v1167_v27 = vmul.f32 %v2610_v24, %v1131_v15  ;;  %v1326_v28 = vpop.permute.xlu1 %1325  ;;  %v1381_v15 = vmul.f32 %v2564_v7, %v2621_v45  ;;  %v1491_v19 = vmul.f32 %v2610_v24, %v1475_v38 }
 0x28d   : > { %v1040_v16 = vpop.permute.xlu0 %1039  ;;  %v1383_v53 = vmul.f32 %v2564_v7, %v1326_v28  ;;  %v976_v48 = vsub.f32 %v716_v59, %v944_v33 }
 0x28e   : > { %v1199_v30 = vmul.f32 %v1167_v27, %v1167_v27  ;;  %v1229_v22 = vadd.f32 %v1228_v11, %v1198_v25  ;;  %v1133_v34 = vmul.f32 %v1040_v16, %v973_v36  ;;  %v715_v11 = vld [vmem:[#allocation2 + $0x68] sm:$0xff]  ;;  %v1268_v27 = vld [vmem:[%s2645_s1 + $0x18] sm:$0xff] }
 0x290   : > { %v1230_v23 = vadd.f32 %v1229_v22, %v1199_v30  ;;  %v1169_v46 = vmul.f32 %v2610_v24, %v1133_v34  ;;  %v975_v30 = vsub.f32 %v715_v11, %v943_v20  ;;  %v1397_v22 = vsub.f32 %v1268_v27, %v1381_v15 }
 0x291   : > { %v1044_v56 = vpop.permute.xlu1 %1043  ;;  %v1412_v41 = vpop.permute.xlu0 %1411  ;;  %v1542_v34 = vsel %vm1526_vm2, %v1491_v19, 0.0  ;;  %v1511_v27 = vadd.s32 32, %v2651_v51 }
 0x292   : > { %v1201_v49 = vmul.f32 %v1169_v46, %v1169_v46  ;;  %v1231_v10 = vadd.f32 %v1230_v23, %v1200_v35  ;;  %v1134_v31 = vmul.f32 %v1044_v56, %v974_v18  ;;  %v1474_v0 = vmul.f32 %v1412_v41, %v1394_v44  ;;  %v1269_v23 = vld [vmem:[%s2645_s1 + $0x20] sm:$0xff] }
 0x293   : > { %v1382_v35 = vmul.f32 %v2564_v7, %v2635_v29  ;;  %v1510_v44 = vadd.s32 24, %v2651_v51  ;;  %v1270_v29 = vld [vmem:[%s2645_s1 + $0x28] sm:$0xff]  ;;  %vm1529_vm5 = vcmp.eq.s32.totalorder %v1511_v27, %v2656_v42 }
 0x294   : > { %v1232_v36 = vadd.f32 %v1231_v10, %v1201_v49  ;;  %v1170_v25 = vmul.f32 %v2610_v24, %v1134_v31  ;;  %v1490_v14 = vmul.f32 %v2610_v24, %v1474_v0  ;;  %v945_v10 = vmul.f32 %v2564_v7, %v2517_v52 }
 0x295   : > { %v1428_v43 = vpop.permute.xlu1 %1427  ;;  %v1420_v50 = vpop.permute.xlu0 %1419  ;;  %v1398_v0 = vsub.f32 %v1269_v23, %v1382_v35  ;;  %vm1528_vm4 = vcmp.eq.s32.totalorder %v1510_v44, %v2656_v42  ;;  %v1385_v52 = vmul.f32 %v2564_v7, %v2582_v26 }
 0x296   : > { %v1202_v16 = vmul.f32 %v1170_v25, %v1170_v25  ;;  %v1541_v45 = vsel %vm1525_vm1, %v1490_v14, 0.0  ;;  %v1476_v37 = vmul.f32 %v1420_v50, %v1396_v13  ;;  %v717_v13 = vld [vmem:[#allocation2 + $0x78] sm:$0xff]  ;;  %v1399_v14 = vsub.f32 %v1270_v29, %v1383_v53 }
 0x297   : > { %v1557_v38 = vadd.f32 %v1542_v34, %v1541_v45  ;;  %v977_v50 = vsub.f32 %v717_v13, %v945_v10  ;;  %v1272_v34 = vld [vmem:[%s2645_s1 + $0x38] sm:$0xff]  ;;  %vm1580_vm1 = vcmask 1040384  }
 0x298   : > { %v1233_v39 = vadd.f32 %v1232_v36, %v1202_v16  ;;  %v1492_v18 = vmul.f32 %v2610_v24, %v1476_v37  ;;  %v1478_v36 = vmul.f32 %v1428_v43, %v1398_v0  ;;  %v1384_v43 = vmul.f32 %v2564_v7, %v2577_v21 }
 0x299   : > { %v1048_v46 = vpop.permute.xlu1 %1047  ;;  %v1424_v17 = vpop.permute.xlu0 %1423  ;;  %v1401_v59 = vsub.f32 %v1272_v34, %v1385_v52  ;;  %v1513_v21 = vadd.s32 48, %v2651_v51  ;;  %v1514_v0 = vadd.s32 56, %v2651_v51  ;;  %v718_v52 = vld [vmem:[#allocation2 + $0x80] sm:$0xff]  ;;  %v720_v34 = vld [vmem:[#allocation2 + $0x90] sm:$0xff] }
 0x29a   : > { %v1543_v56 = vsel %vm1527_vm3, %v1492_v18, 0.0  ;;  %v1135_v41 = vmul.f32 %v1048_v46, %v975_v30  ;;  %v1477_v49 = vmul.f32 %v1424_v17, %v1397_v22  ;;  %v1512_v30 = vadd.s32 40, %v2651_v51 }
 0x29b   : > { %v1558_v31 = vadd.f32 %v1557_v38, %v1543_v56  ;;  %v1494_v35 = vmul.f32 %v2610_v24, %v1478_v36  ;;  %vm1531_vm7 = vcmp.eq.s32.totalorder %v1513_v21, %v2656_v42  ;;  %vm1532_vm8 = vcmp.eq.s32.totalorder %v1514_v0, %v2656_v42 }
 0x29c   : > { %v1171_v20 = vmul.f32 %v2610_v24, %v1135_v41  ;;  %v1493_v15 = vmul.f32 %v2610_v24, %v1477_v49  ;;  %vm1530_vm6 = vcmp.eq.s32.totalorder %v1512_v30, %v2656_v42  ;;  %v946_v36 = vmul.f32 %v2564_v7, %v2525_v55 }
 0x29d   : > { %v1432_v19 = vpop.permute.xlu1 %1431  ;;  %v1052_v28 = vpop.permute.xlu0 %1051  ;;  %v1545_v56 = vsel %vm1529_vm5, %v1494_v35, 0.0  ;;  %v949_v55 = vmul.f32 %v2564_v7, %v2528_v57  ;;  %v719_v35 = vld [vmem:[#allocation2 + $0x88] sm:$0xff] }
 0x29e   : > { %v1203_v25 = vmul.f32 %v1171_v20, %v1171_v20  ;;  %v1136_v11 = vmul.f32 %v1052_v28, %v976_v48  ;;  %v1544_v45 = vsel %vm1528_vm4, %v1493_v15, 0.0  ;;  %v1479_v37 = vmul.f32 %v1432_v19, %v1399_v14 }
 0x29f   : > { %v1559_v23 = vadd.f32 %v1558_v31, %v1544_v45 }
 0x2a0   : > { %v1234_v16 = vadd.f32 %v1233_v39, %v1203_v25  ;;  %v1172_v33 = vmul.f32 %v2610_v24, %v1136_v11  ;;  %v1271_v39 = vld [vmem:[%s2645_s1 + $0x30] sm:$0xff]  ;;  %v1495_v46 = vmul.f32 %v2610_v24, %v1479_v37 }
 0x2a1   : > { %v1056_v22 = vpop.permute.xlu0 %1055  ;;  %v1400_v10 = vsub.f32 %v1271_v39, %v1384_v43  ;;  %v1560_v29 = vadd.f32 %v1559_v23, %v1545_v56 }
 0x2a2   : > { %v1204_v18 = vmul.f32 %v1172_v33, %v1172_v33  ;;  %v1137_v26 = vmul.f32 %v1056_v22, %v977_v50  ;;  %v1341_v38 = vpop.permute.xlu1 %1340  ;;  %v1546_v20 = vsel %vm1530_vm6, %v1495_v46, 0.0  ;;  %v948_v33 = vmul.f32 %v2564_v7, %v2530_v58 }
 0x2a3   : > { %v1561_v28 = vadd.f32 %v1560_v29, %v1546_v20  ;;  %v947_v22 = vmul.f32 %v2564_v7, %v2523_v54  ;;  %v1386_v58 = vmul.f32 %v2564_v7, %v1341_v38  ;;  %v1273_v54 = vld [vmem:[%s2645_s1 + $0x40] sm:$0xff] }
 0x2a4   : > { %v1235_v44 = vadd.f32 %v1234_v16, %v1204_v18  ;;  %v1173_v17 = vmul.f32 %v2610_v24, %v1137_v26  ;;  %v978_v16 = vsub.f32 %v718_v52, %v946_v36  ;;  %v721_v18 = vld [vmem:[#allocation2 + $0x98] sm:$0xff]  ;;  %v980_v23 = vsub.f32 %v720_v34, %v948_v33 }
 0x2a5   : > { %v1440_v53 = vpop.permute.xlu0 %1439  ;;  %v1402_v29 = vsub.f32 %v1273_v54, %v1386_v58  ;;  %v1388_v52 = vmul.f32 %v2564_v7, %v2587_v32 }
 0x2a6   : > { %v1205_v41 = vmul.f32 %v1173_v17, %v1173_v17  ;;  %v1481_v49 = vmul.f32 %v1440_v53, %v1401_v59  ;;  %v981_v59 = vsub.f32 %v721_v18, %v949_v55  ;;  %v1517_v55 = vadd.s32 80, %v2651_v51 }
 0x2a7   : > { %v1436_v31 = vpop.permute.xlu1 %1435  ;;  %v1518_v18 = vadd.s32 88, %v2651_v51 }
 0x2a8   : > { %v1236_v15 = vadd.f32 %v1235_v44, %v1205_v41  ;;  %v1480_v48 = vmul.f32 %v1436_v31, %v1400_v10  ;;  %v1497_v13 = vmul.f32 %v2610_v24, %v1481_v49  ;;  %v979_v44 = vsub.f32 %v719_v35, %v947_v22  ;;  %v1274_v49 = vld [vmem:[%s2645_s1 + $0x48] sm:$0xff] }
 0x2a9   : > { %v1068_v45 = vpop.permute.xlu0 %1067  ;;  %vm1535_vm11 = vcmp.eq.s32.totalorder %v1517_v55, %v2656_v42  ;;  %vm1536_vm12 = vcmp.eq.s32.totalorder %v1518_v18, %v2656_v42 }
 0x2aa   : > { %v1496_v19 = vmul.f32 %v2610_v24, %v1480_v48  ;;  %v1548_v27 = vsel %vm1532_vm8, %v1497_v13, 0.0  ;;  %v1140_v17 = vmul.f32 %v1068_v45, %v980_v23  ;;  %v1515_v13 = vadd.s32 64, %v2651_v51 }
 0x2ac   : > { %v1547_v25 = vsel %vm1531_vm7, %v1496_v19, 0.0  ;;  %v1346_v14 = vpop.permute.xlu1 %1345  ;;  %v1176_v10 = vmul.f32 %v2610_v24, %v1140_v17  ;;  %v1389_v19 = vmul.f32 %v2564_v7, %v2592_v40  ;;  %vm1533_vm9 = vcmp.eq.s32.totalorder %v1515_v13, %v2656_v42 }
 0x2ad   : > { %v1562_v11 = vadd.f32 %v1561_v28, %v1547_v25  ;;  %v1072_v46 = vpop.permute.xlu0 %1071  ;;  %v1387_v56 = vmul.f32 %v2564_v7, %v1346_v14  ;;  %v1276_v14 = vld [vmem:[%s2645_s1 + $0x58] sm:$0xff] }
 0x2ae   : > { %v1141_v57 = vmul.f32 %v1072_v46, %v981_v59  ;;  %v1208_v28 = vmul.f32 %v1176_v10, %v1176_v10  ;;  %v1405_v22 = vsub.f32 %v1276_v14, %v1389_v19  ;;  %v950_v59 = vmul.f32 %v2564_v7, %v2537_v61  ;;  %v723_v19 = vld [vmem:[#allocation2 + $0xa8] sm:$0xff] }
 0x2af   : > { %v1563_v50 = vadd.f32 %v1562_v11, %v1548_v27  ;;  %v1516_v11 = vadd.s32 72, %v2651_v51  ;;  %v951_v61 = vmul.f32 %v2564_v7, %v2535_v60  ;;  %v1278_v60 = vld [vmem:[%s2645_s1 + $0x68] sm:$0xff] }
 0x2b0   : > { %v1177_v20 = vmul.f32 %v2610_v24, %v1141_v57 }
 0x2b1   : > { %v1060_v37 = vpop.permute.xlu1 %1059  ;;  %v1456_v33 = vpop.permute.xlu0 %1455  ;;  %vm1534_vm10 = vcmp.eq.s32.totalorder %v1516_v11, %v2656_v42 }
 0x2b2   : > { %v1138_v30 = vmul.f32 %v1060_v37, %v978_v16  ;;  %v1209_v27 = vmul.f32 %v1177_v20, %v1177_v20 }
 0x2b4   : > { %v1174_v43 = vmul.f32 %v2610_v24, %v1138_v30  ;;  %v1275_v30 = vld [vmem:[%s2645_s1 + $0x50] sm:$0xff] }
 0x2b5   : > { %v1444_v26 = vpop.permute.xlu1 %1443  ;;  %v1404_v32 = vsub.f32 %v1275_v30, %v1388_v52  ;;  %v1084_v20 = vpop.permute.xlu0 %1083  ;;  %v983_v52 = vsub.f32 %v723_v19, %v951_v61  ;;  %v1392_v30 = vmul.f32 %v2564_v7, %v2595_v47  ;;  %v726_v61 = vld [vmem:[#allocation2 + $0xc0] sm:$0xff] }
 0x2b6   : > { %v1206_v39 = vmul.f32 %v1174_v43, %v1174_v43  ;;  %v1482_v38 = vmul.f32 %v1444_v26, %v1402_v29  ;;  %v1485_v43 = vmul.f32 %v1456_v33, %v1405_v22  ;;  %v724_v29 = vld [vmem:[#allocation2 + $0xb0] sm:$0xff] }
 0x2b8   : > { %v1237_v53 = vadd.f32 %v1236_v15, %v1206_v39  ;;  %v1403_v15 = vsub.f32 %v1274_v49, %v1387_v56  ;;  %v1498_v16 = vmul.f32 %v2610_v24, %v1482_v38  ;;  %v722_v56 = vld [vmem:[#allocation2 + $0xa0] sm:$0xff]  ;;  %v952_v49 = vmul.f32 %v2564_v7, %v2544_v63 }
 0x2b9   : > { %v1064_v21 = vpop.permute.xlu1 %1063  ;;  %v1277_v38 = vld [vmem:[%s2645_s1 + $0x60] sm:$0xff] }
 0x2ba   : > { %v1139_v41 = vmul.f32 %v1064_v21, %v979_v44  ;;  %v1549_v35 = vsel %vm1533_vm9, %v1498_v16, 0.0  ;;  %v1501_v44 = vmul.f32 %v2610_v24, %v1485_v43  ;;  %v1519_v16 = vadd.s32 96, %v2651_v51 }
 0x2bb   : > { %v1564_v46 = vadd.f32 %v1563_v50, %v1549_v35  ;;  %v982_v50 = vsub.f32 %v722_v56, %v950_v59 }
 0x2bc   : > { %v1175_v0 = vmul.f32 %v2610_v24, %v1139_v41  ;;  %v1552_v57 = vsel %vm1536_vm12, %v1501_v44, 0.0  ;;  %vm1537_vm13 = vcmp.eq.s32.totalorder %v1519_v16, %v2656_v42  ;;  %v1521_v44 = vadd.s32 112, %v2651_v51 }
 0x2bd   : > { %v1448_v31 = vpop.permute.xlu1 %1447 }
 0x2be   : > { %v1207_v48 = vmul.f32 %v1175_v0, %v1175_v0  ;;  %v1483_v25 = vmul.f32 %v1448_v31, %v1403_v15  ;;  %v984_v15 = vsub.f32 %v724_v29, %v952_v49  ;;  %v954_v29 = vmul.f32 %v2564_v7, %v2551_v2  ;;  %v729_v2 = vld [vmem:[#allocation2 + $0xd8] sm:$0xff] }
 0x2bf   : > { %vm1539_vm15 = vcmp.eq.s32.totalorder %v1521_v44, %v2656_v42 }
 0x2c0   : > { %v1238_v36 = vadd.f32 %v1237_v53, %v1207_v48  ;;  %v1499_v40 = vmul.f32 %v2610_v24, %v1483_v25  ;;  %v1144_v63 = vmul.f32 %v1084_v20, %v984_v15 }
 0x2c2   : > { %v1239_v45 = vadd.f32 %v1238_v36, %v1208_v28  ;;  %v1361_v37 = vpop.permute.xlu1 %1360  ;;  %v1550_v23 = vsel %vm1534_vm10, %v1499_v40, 0.0  ;;  %v1180_v22 = vmul.f32 %v2610_v24, %v1144_v63  ;;  %v1280_v40 = vld [vmem:[%s2645_s1 + $0x78] sm:$0xff]  ;;  %v986_v63 = vsub.f32 %v726_v61, %v954_v29 }
 0x2c3   : > { %v1565_v17 = vadd.f32 %v1564_v46, %v1550_v23  ;;  %v1390_v0 = vmul.f32 %v2564_v7, %v1361_v37  ;;  %v1393_v37 = vmul.f32 %v2564_v7, %v2604_v12  ;;  %v953_v12 = vmul.f32 %v2564_v7, %v2541_v62 }
 0x2c4   : > { %v1240_v34 = vadd.f32 %v1239_v45, %v1209_v27  ;;  %v1472_v27 = vpop.permute.xlu0 %1471  ;;  %v955_v62 = vmul.f32 %v2564_v7, %v2548_v1 }
 0x2c5   : > { %v1406_v36 = vsub.f32 %v1277_v38, %v1390_v0  ;;  %v727_v0 = vld [vmem:[#allocation2 + $0xc8] sm:$0xff] }
 0x2c6   : > { %v987_v19 = vsub.f32 %v727_v0, %v955_v62 }
 0x2c7   : > { %v1452_v26 = vpop.permute.xlu1 %1451 }
 0x2c8   : > { %v1484_v39 = vmul.f32 %v1452_v26, %v1404_v32  ;;  %v1279_v32 = vld [vmem:[%s2645_s1 + $0x70] sm:$0xff]  ;;  %v1409_v26 = vsub.f32 %v1280_v40, %v1393_v37  ;;  %v1096_v46 = vpop.permute.xlu0 %1095  ;;  %v731_v40 = vld [vmem:[#allocation2 + $0xe8] sm:$0xff] }
 0x2ca   : > { %v1500_v58 = vmul.f32 %v2610_v24, %v1484_v39  ;;  %v1212_v39 = vmul.f32 %v1180_v22, %v1180_v22 }
 0x2cc   : > { %v1551_v53 = vsel %vm1535_vm11, %v1500_v58, 0.0  ;;  %v1366_v54 = vpop.permute.xlu1 %1365  ;;  %v1408_v58 = vsub.f32 %v1279_v32, %v1392_v30  ;;  %v1104_v1 = vpop.permute.xlu0 %1103  ;;  %v730_v32 = vld [vmem:[#allocation2 + $0xe0] sm:$0xff] }
 0x2cd   : > { %v1566_v21 = vadd.f32 %v1565_v17, %v1551_v53  ;;  %v1391_v25 = vmul.f32 %v2564_v7, %v1366_v54  ;;  %v1489_v17 = vmul.f32 %v1472_v27, %v1409_v26 }
 0x2cf   : > { %v1567_v41 = vadd.f32 %v1566_v21, %v1552_v57  ;;  %v1407_v35 = vsub.f32 %v1278_v60, %v1391_v25  ;;  %v1522_v21 = vadd.s32 120, %v2651_v51  ;;  %v725_v57 = vld [vmem:[#allocation2 + $0xb8] sm:$0xff]  ;;  %v1505_v20 = vmul.f32 %v2610_v24, %v1489_v17 }
 0x2d0   : > { %v956_v25 = vmul.f32 %v2564_v7, %v2555_v4  ;;  %v1112_v22 = vpop.permute.xlu0 %1111 }
 0x2d1   : > { %v1076_v10 = vpop.permute.xlu1 %1075  ;;  %vm1540_vm0 = vcmp.eq.s32.totalorder %v1522_v21, %v2656_v42  ;;  %v732_v21 = vld [vmem:[#allocation2 + $0xf0] sm:$0xff] }
 0x2d2   : > { %v1142_v31 = vmul.f32 %v1076_v10, %v982_v50 }
 0x2d4   : > { %v1178_v48 = vmul.f32 %v2610_v24, %v1142_v31 }
 0x2d5   : > { %v1460_v13 = vpop.permute.xlu1 %1459 }
 0x2d6   : > { %v1210_v28 = vmul.f32 %v1178_v48, %v1178_v48  ;;  %v1486_v11 = vmul.f32 %v1460_v13, %v1406_v36  ;;  %v957_v48 = vmul.f32 %v2564_v7, %v2553_v3 }
 0x2d8   : > { %v1241_v14 = vadd.f32 %v1240_v34, %v1210_v28  ;;  %v1520_v34 = vadd.s32 104, %v2651_v51  ;;  %v1502_v55 = vmul.f32 %v2610_v24, %v1486_v11  ;;  %v985_v51 = vsub.f32 %v725_v57, %v953_v12 }
 0x2d9   : > { %v1080_v45 = vpop.permute.xlu1 %1079  ;;  %v1147_v11 = vmul.f32 %v1096_v46, %v987_v19  ;;  %v989_v27 = vsub.f32 %v729_v2, %v957_v48  ;;  %v733_v46 = vld [vmem:[#allocation2 + $0xf8] sm:$0xff] }
 0x2da   : > { %v1143_v33 = vmul.f32 %v1080_v45, %v983_v52  ;;  %vm1538_vm14 = vcmp.eq.s32.totalorder %v1520_v34, %v2656_v42  ;;  %v1553_v59 = vsel %vm1537_vm13, %v1502_v55, 0.0  ;;  %v728_v42 = vld [vmem:[#allocation2 + $0xd0] sm:$0xff]  ;;  %v959_v45 = vmul.f32 %v2564_v7, %v2559_v5 }
 0x2db   : > { %v1568_v31 = vadd.f32 %v1567_v41, %v1553_v59  ;;  %v1149_v30 = vmul.f32 %v1104_v1, %v989_v27  ;;  %v1183_v34 = vmul.f32 %v2610_v24, %v1147_v11  ;;  %v961_v5 = vmul.f32 %v2564_v7, %v2568_v8 }
 0x2dc   : > { %v1179_v43 = vmul.f32 %v2610_v24, %v1143_v33  ;;  %v958_v33 = vmul.f32 %v2564_v7, %v2561_v6  ;;  %v991_v26 = vsub.f32 %v731_v40, %v959_v45  ;;  %v960_v6 = vmul.f32 %v2564_v7, %v2570_v9 }
 0x2dd   : > { %v1464_v18 = vpop.permute.xlu1 %1463  ;;  %v1215_v17 = vmul.f32 %v1183_v34, %v1183_v34  ;;  %v993_v62 = vsub.f32 %v733_v46, %v961_v5 }
 0x2de   : > { %v1211_v23 = vmul.f32 %v1179_v43, %v1179_v43  ;;  %v1487_v47 = vmul.f32 %v1464_v18, %v1407_v35  ;;  %v988_v35 = vsub.f32 %v728_v42, %v956_v25  ;;  %v990_v44 = vsub.f32 %v730_v32, %v958_v33 }
 0x2df   : > { %v1151_v59 = vmul.f32 %v1112_v22, %v991_v26  ;;  %v992_v7 = vsub.f32 %v732_v21, %v960_v6 }
 0x2e0   : > { %v1242_v53 = vadd.f32 %v1241_v14, %v1211_v23  ;;  %v1503_v54 = vmul.f32 %v2610_v24, %v1487_v47  ;;  %v1556_v14 = vsel %vm1540_vm0, %v1505_v20, 0.0 }
 0x2e1   : > { %v1468_v56 = vpop.permute.xlu1 %1467  ;;  %v1187_v0 = vmul.f32 %v2610_v24, %v1151_v59 }
 0x2e2   : > { %v1554_v50 = vsel %vm1538_vm14, %v1503_v54, 0.0  ;;  %v1488_v49 = vmul.f32 %v1468_v56, %v1408_v58  ;;  %v1243_v10 = vadd.f32 %v1242_v53, %v1212_v39  ;;  %v1185_v39 = vmul.f32 %v2610_v24, %v1149_v30  ;;  %v1120_v56 = vpop.permute.xlu0 %1119 }
 0x2e3   : > { %v1569_v15 = vadd.f32 %v1568_v31, %v1554_v50  ;;  %v1153_v31 = vmul.f32 %v1120_v56, %v993_v62  ;;  %v1219_v19 = vmul.f32 %v1187_v0, %v1187_v0 }
 0x2e4   : > { %v1504_v38 = vmul.f32 %v2610_v24, %v1488_v49  ;;  %v1217_v29 = vmul.f32 %v1185_v39, %v1185_v39 }
 0x2e5   : > { %v1088_v13 = vpop.permute.xlu1 %1087  ;;  %v1189_v2 = vmul.f32 %v2610_v24, %v1153_v31 }
 0x2e6   : > { %v1555_v28 = vsel %vm1539_vm15, %v1504_v38, 0.0  ;;  %v1145_v41 = vmul.f32 %v1088_v13, %v985_v51 }
 0x2e7   : > { %v1570_v36 = vadd.f32 %v1569_v15, %v1555_v28 }
 0x2e8   : > { %v1181_v52 = vmul.f32 %v2610_v24, %v1145_v41 }
 0x2e9   : > { %v1571_v3 = vadd.f32 %v1570_v36, %v1556_v14  ;;  %v1092_v16 = vpop.permute.xlu1 %1091 }
 0x2ea   : > { %v1213_v60 = vmul.f32 %v1181_v52, %v1181_v52  ;;  %v1146_v37 = vmul.f32 %v1092_v16, %v986_v63  ;;  %v1221_v52 = vmul.f32 %v1189_v2, %v1189_v2 }
 0x2eb   : > { %v1572_v4 = vrot.slane %v1571_v3, 4 }
 0x2ec   : > { %v1244_v55 = vadd.f32 %v1243_v10, %v1213_v60  ;;  %v1182_v43 = vmul.f32 %v2610_v24, %v1146_v37 }
 0x2ed   : > { %v1100_v18 = vpop.permute.xlu1 %1099  ;;  %v1573_v12 = vadd.f32 %v1572_v4, %v1571_v3 }
 0x2ee   : > { %v1214_v23 = vmul.f32 %v1182_v43, %v1182_v43  ;;  %v1148_v47 = vmul.f32 %v1100_v18, %v988_v35 }
 0x2ef   : > { %v1574_v58 = vrot.slane %v1573_v12, 2 }
 0x2f0   : > { %v1245_v53 = vadd.f32 %v1244_v55, %v1214_v23  ;;  %v1184_v54 = vmul.f32 %v2610_v24, %v1148_v47 }
 0x2f1   : > { %v1108_v57 = vpop.permute.xlu1 %1107  ;;  %v1575_v8 = vadd.f32 %v1574_v58, %v1573_v12 }
 0x2f2   : > { %v1216_v50 = vmul.f32 %v1184_v54, %v1184_v54  ;;  %v1246_v49 = vadd.f32 %v1245_v53, %v1215_v17  ;;  %v1150_v10 = vmul.f32 %v1108_v57, %v990_v44 }
 0x2f3   : > { %v1576_v9 = vrot.slane %v1575_v8, 1 }
 0x2f4   : > { %v1247_v20 = vadd.f32 %v1246_v49, %v1216_v50  ;;  %v1186_v38 = vmul.f32 %v2610_v24, %v1150_v10 }
 0x2f5   : > { %v1116_v51 = vpop.permute.xlu1 %1115  ;;  %v1577_v61 = vadd.f32 %v1576_v9, %v1575_v8 }
 0x2f6   : > { %v1218_v48 = vmul.f32 %v1186_v38, %v1186_v38  ;;  %v1248_v1 = vadd.f32 %v1247_v20, %v1217_v29  ;;  %v1152_v15 = vmul.f32 %v1116_v51, %v992_v7 }
 0x2f7   : > { %v1578_v13 = vsub.f32 1.0, %v1577_v61  ;;  %v1592_v11 = vmul.f32 %v1577_v61, %v1577_v61 }
 0x2f8   : > { %v1249_v28 = vadd.f32 %v1248_v1, %v1218_v48  ;;  %v1188_v41 = vmul.f32 %v2610_v24, %v1152_v15 }
 0x2f9   : > { %v1579_v36 = vmul.f32 %v1578_v13, %v1578_v13  ;;  %v1593_v16 = vsel %vm1580_vm1, %v1592_v11, 0.0 }
 0x2fa   : > { %v1220_v63 = vmul.f32 %v1188_v41, %v1188_v41  ;;  %v1250_v25 = vadd.f32 %v1249_v28, %v1219_v19 }
 0x2fb   : > { %v1581_v14 = vsel %vm1580_vm1, %v1579_v36, 0.0 }
 0x2fc   : > { %v1251_v27 = vadd.f32 %v1250_v25, %v1220_v63  ;;  %1582 = vadd.xlane.f32.xlu0 %v1581_v14 }
 0x2fe   : > { %v1252_v3 = vadd.f32 %v1251_v27, %v1221_v52 }
 0x300   : > { %1594 = vadd.xlane.f32.xlu0 %v1593_v16  ;;  %1253 = vadd.xlane.f32.xlu1 %v1252_v3 }
 0x389   : > { %v1583_v42 = vpop.xlane.xlu0 %1582 }
 0x38a   : > { %v1584_v45 = vrot.slane %v1583_v42, 4 }
 0x38c   : > { %v1585_v60 = vadd.f32 %v1584_v45, %v1583_v42 }
 0x38d   : > { %v1595_v37 = vpop.xlane.xlu0 %1594  ;;  %v1254_v33 = vpop.xlane.xlu1 %1253 }
 0x38e   : > { %v1586_v30 = vrot.slane %v1585_v60, 2  ;;  %v1596_v24 = vrot.slane %v1595_v37, 4  ;;  %v1255_v22 = vrot.slane %v1254_v33, 4 }
 0x390   : > { %v1597_v40 = vadd.f32 %v1596_v24, %v1595_v37  ;;  %v1256_v4 = vadd.f32 %v1255_v22, %v1254_v33  ;;  %v1587_v34 = vadd.f32 %v1586_v30, %v1585_v60 }
 0x392   : > { %v1598_v55 = vrot.slane %v1597_v40, 2  ;;  %v1257_v43 = vrot.slane %v1256_v4, 2  ;;  %v1588_v18 = vrot.slane %v1587_v34, 1 }
 0x394   : > { %v1599_v35 = vadd.f32 %v1598_v55, %v1597_v40  ;;  %v1258_v32 = vadd.f32 %v1257_v43, %v1256_v4  ;;  %v1589_v47 = vadd.f32 %v1588_v18, %v1587_v34 }
 0x396   : > { %v1259_v12 = vrot.slane %v1258_v32, 1  ;;  %v1600_v5 = vrot.slane %v1599_v35, 1 }
 0x398   : > { %v1260_v26 = vadd.f32 %v1259_v12, %v1258_v32  ;;  %v1601_v23 = vadd.f32 %v1600_v5, %v1599_v35 }
 0x39a   : > { %1826 = vpush %v1260_v26 }
 0x39b   : > { %1828 = vpush %v1589_v47 }
 0x39c   : > { %1830 = vpush %v1601_v23 }
 0x3cb   : > { %s1827_s6 = spop %1826 }
 0x3cc   : > { %v1262_v6 = vstv %s1827_s6  ;;  %s1829_s29 = spop %1828 }
 0x3cd   : > { %s1831_s18 = spop %1830  ;;  %v1591_v58 = vstv %s1829_s29 }
 0x3ce   : > { %v1603_v39 = vstv %s1831_s18 }
 0x3cf   : > { %v1604_v46 = vsub.f32 %v1262_v6, %v1603_v39 }
 0x3d1   : > { %v1605_v44 = vmul.f32 0.00390625, %v1604_v46 }
 0x3d3   : > { %v1606_v17 = vadd.f32 %v1605_v44, %v1591_v58 }
 0x3d5   : > { %1607 = vst [vmem:[%s288_s27] sm:$0xff] %v1606_v17 }
 0x3d6 PF: > { %s1768_s5 = sshll.u32 %s2041_s21, 7  ;;  %s1622_s26 = sshll.u32 %s288_s27, 4  ;;  %s1623_s26 = int_to_ptr.vmem [resolvable:$true] %s1622_s26 }
 0x3d7   : > { %s2809_s14 = scalar_lea.hbm %s2870_s4, %s1768_s5  ;;  %s2881_s20 = sand.u32 1, %s2021_s16  }
 0x3d8   : > { %s1609_s30 = scalar_lea.sflag [#allocation5], %s2881_s20  ;;  %s1943_s8 = scalar_lea.vmem %s1623_s26, 128 }
 0x3d9   : > { %p1944_p8 = scmp.ne.s32.totalorder %s1623_s26, %s1943_s8  ;;  %s2058_s9 = smov [#allocation4]  }
 0x3da   : > { %s1947_s1 = sshll.u32 %s2058_s9, 4  ;;  %s1948_s1 = int_to_ptr.vmem [resolvable:$false] %s1947_s1 }
 0x3db   : > { %p1945_p9 = pnand %p1944_p8, %p2156_p7  ;;  %s1949_s6 = scalar_lea.vmem %s1948_s1, 256 }
 0x3dc   : > { %p1950_p11 = scmp.lt.s32.totalorder %s1623_s26, %s1948_s1  ;;  %p1951_p13 = scmp.lt.s32.totalorder %s1949_s6, %s1943_s8 }
 0x3dd   : > { %p1946_p10 = pneg %p1945_p9 }
 0x3de   : > { %p1952_p0 = por %p1951_p13, %p1950_p11 }
 0x3e0   : > { %p1953_p1 = pnand %p1952_p0, %p1946_p10 }
 0x3e2   : > { %1956 = shalt.err (!%p1953_p1)
}
 0x3e3   : > { %s1957_s21 = scalar_lea.hbm %s2809_s14, 128  ;;  %s1961_s29 = scalar_lea.hbm %s2870_s4, 256 }
 0x3e4   : > { %p1958_p2 = scmp.ne.s32.totalorder %s2809_s14, %s1957_s21  ;;  %p1962_p5 = scmp.lt.u32.totalorder %s2809_s14, %s2870_s4 }
 0x3e5   : > { %p1963_p6 = scmp.lt.u32.totalorder %s1961_s29, %s1957_s21  ;;  %p1965_p9 = scmp.lt.u32.totalorder %s1957_s21, %s2809_s14 }
 0x3e6   : > { %p1959_p3 = pnand %p1958_p2, %p2156_p7 }
 0x3e7   : > { %p1964_p8 = por %p1963_p6, %p1962_p5 }
 0x3e8   : > { %p1960_p4 = pneg %p1959_p3 }
 0x3e9   : > { %p1966_p10 = por %p1965_p9, %p1964_p8 }
 0x3eb   : > { %p1967_p11 = pnand %p1966_p10, %p1960_p4 }
 0x3ed   : > { %1970 = shalt.err (!%p1967_p11)
}
 0x3ee   : > { %1832 = dma.vmem_to_hbm [thread:$0]  (%p2156_p7), %s1623_s26, 128, %s2809_s14, %s1609_s30  }
 0x3ef PF: > { %p1838_p13 = scmp.ge.s32.totalorder %s2053_s24, 2  ;;  %s1634_s28 = sand.u32 1, %s2017_s15  }
 0x3f0   : > { %s1635_s13 = scalar_lea.sflag [#allocation5], %s1634_s28 }
 0x3f1   : > { %p1835_p0 = pnand %p1838_p13, %p2164_p12 }
 0x3f3   : > { %2012 = dma.done.wait (!%p1835_p0), %s1635_s13, 128  }
 0x3f4   : > { %2014 = vsyncadd (!%p1835_p0), %s1635_s13, 4294967168  ;;  %s17_s24 = sadd.s32 1, %s2053_s24   ;;  %s2882_s7 = sld [smem:[#allocation7_spill]] }
 0x3f5   : > { %p14_p1 = scmp.ge.s32.totalorder %s17_s24, 6   ;;  %s2883_s14 = sld [smem:[#allocation8_spill]] }
 0x3f6   : > { %s2884_s15 = smov %s2021_s16  ;;  %s2885_s16 = smov %s2025_s17 }
 0x3f7   : > { %s2886_s17 = smov %s2169_s11  ;;  %s2887_s18 = smov %s2033_s19 }
 0x3f8   : > { %s2888_s19 = smov %s2172_s12  ;;  %s2889_s20 = smov %s2045_s22 }
 0x3f9   : > { %s2890_s21 = smov %s2049_s23  ;;  %16 = sbr.rel (!%p14_p1) target bundleno = 8 (0x8), region = 133 }
 0x3fa   : > { %s2891_s22 = smov %s2882_s7 }
 0x3fb   : > { %s2892_s23 = smov %s2883_s14 }
 0x400   :  { %1640 = vsyncpa [#allocation5], 1 }
 0x401   :  { %1642 = vsyncpa [#allocation5 + $0x1], 1 }

</bundles_post_ra>
